<compile_context>
chip_gen: v5e
topology: v5e:2x2
jax: 0.10.0
libtpu: 0.0.40
codegen_flags: <defaults>
</compile_context>

<pallas_src>
import functools

import jax
import jax.numpy as jnp
from jax import lax
from jax.experimental import pallas as pl
from jax.experimental.pallas import tpu as pltpu


def _circle_loss2_kernel(anchor_ref, pn_ref, out_ref, *, m, gamma, num_pos,
                         inv_batch, use_mxu):
    a = anchor_ref[...].astype(jnp.float32)    # (TB, D)
    pn = pn_ref[...].astype(jnp.float32)       # (TB, K, D), K = P + N

    # F.normalize uses x / max(||x||, eps) with eps = 1e-12.
    # Equivalent with rsqrt: rsqrt(max(||x||^2, eps^2)).
    eps2 = 1e-24

    inv_a = lax.rsqrt(jnp.maximum(jnp.sum(a * a, axis=-1, keepdims=True), eps2))   # (TB, 1)
    inv_pn = lax.rsqrt(jnp.maximum(jnp.sum(pn * pn, axis=-1), eps2))               # (TB, K)

    # Raw inner products along D; normalization applied to the (TB, K) result
    # instead of the full (TB, K, D) tensors.
    if use_mxu:
        s_raw = jnp.einsum(
            "bqd,bkd->bqk", a[:, None, :], pn,
            preferred_element_type=jnp.float32,
            precision=lax.Precision.HIGHEST,
        )[:, 0, :]                                                                  # (TB, K)
    else:
        s_raw = jnp.sum(a[:, None, :] * pn, axis=-1)                                # (TB, K)

    s = s_raw * inv_a * inv_pn                                                      # cosine sims

    sp = s[:, :num_pos]   # (TB, P)
    sn = s[:, num_pos:]   # (TB, N)

    # detach() in the PyTorch module only affects gradients; forward values match.
    ap = jnp.maximum(-sp + 1.0 + m, 0.0)
    an = jnp.maximum(sn + m, 0.0)
    logit_p = -ap * (sp - (1.0 - m)) * gamma
    logit_n = an * (sn - m) * gamma

    def softplus_lse(x):
        # softplus(logsumexp(x, -1)) = log(1 + sum_i exp(x_i)), computed stably.
        mx = jnp.maximum(jnp.max(x, axis=-1, keepdims=True), 0.0)
        return mx + jnp.log(jnp.exp(-mx) +
                            jnp.sum(jnp.exp(x - mx), axis=-1, keepdims=True))      # (TB, 1)

    # Per-block contribution to mean_b(lse_p) + mean_b(lse_n); 1/B folded in here
    # so no separate finalize step is needed.
    partial = jnp.sum(softplus_lse(logit_p) + softplus_lse(logit_n),
                      keepdims=True) * inv_batch                                    # (1, 1)

    @pl.when(pl.program_id(0) == 0)
    def _():
        out_ref[...] = jnp.zeros_like(out_ref)

    out_ref[...] += partial


def _pick_block_b(batch: int, cap: int = 128) -> int:
    """Largest batch tile <= cap that divides B and keeps the sublane dim legal."""
    if batch <= cap:
        return batch
    for tb in range(cap, 0, -1):
        if batch % tb == 0 and tb % 8 == 0:
            return tb
    return batch  # fall back to fully-resident batch (e.g. large prime B)


def circle_loss2(anchor, pos, neg, m: float = 0.15, gamma: float = 1.0,
                 block_b: int | None = None):
    """Pallas TPU implementation of CircleLoss2.forward. Returns a scalar f32 loss."""
    B, D = anchor.shape
    P = pos.shape[1]
    N = neg.shape[1]
    K = P + N

    # Single big operand -> one pipelined DMA stream and one similarity code path.
    pn = jnp.concatenate([pos, neg], axis=1)          # (B, P+N, D)

    if block_b is None:
        block_b = _pick_block_b(B)
    assert B % block_b == 0, (B, block_b)

    use_mxu = D >= 128  # MXU contraction only pays off once the lane dim is full.

    kernel = functools.partial(
        _circle_loss2_kernel,
        m=float(m), gamma=float(gamma),
        num_pos=P, inv_batch=1.0 / B, use_mxu=use_mxu)

    out = pl.pallas_call(
        kernel,
        out_shape=jax.ShapeDtypeStruct((1, 1), jnp.float32),
        grid_spec=pltpu.PrefetchScalarGridSpec(
            num_scalar_prefetch=0,
            grid=(B // block_b,),
            in_specs=[
                pl.BlockSpec((block_b, D), lambda i: (i, 0)),
                pl.BlockSpec((block_b, K, D), lambda i: (i, 0, 0)),
            ],
            out_specs=pl.BlockSpec((1, 1), lambda i: (0, 0)),
        ),
        compiler_params=pltpu.CompilerParams(
            # Output tile is accumulated across the batch grid axis.
            dimension_semantics=("arbitrary",),
        ),
    )(anchor, pn)
    return out[0, 0]


def _circle_loss2_ref(anchor, pos, neg, m: float = 0.15, gamma: float = 1.0):
    """Pure-JAX reference mirroring the PyTorch forward, for verification."""
    def norm(x):
        return x / jnp.maximum(jnp.linalg.norm(x, axis=-1, keepdims=True), 1e-12)

    a, p, n = norm(anchor), norm(pos), norm(neg)
    # Elementwise-multiply + sum keeps the reference in full f32 precision.
    sp = jnp.sum(a[:, None, :] * p, axis=-1)
    sn = jnp.sum(a[:, None, :] * n, axis=-1)
    ap = jnp.maximum(-sp + 1.0 + m, 0.0)
    an = jnp.maximum(sn + m, 0.0)
    logit_p = -ap * (sp - (1.0 - m)) * gamma
    logit_n = an * (sn - m) * gamma
    return (jax.nn.softplus(jax.nn.logsumexp(logit_p, axis=-1)).mean()
            + jax.nn.softplus(jax.nn.logsumexp(logit_n, axis=-1)).mean())


if __name__ == "__main__":
    key = jax.random.PRNGKey(0)

    # --- check 1: small shapes (VPU multiply+reduce path) -------------------
    B, P, N, D = 8, 8, 16, 32
    ka, kp, kn, key = jax.random.split(key, 4)
    anchor = jax.random.normal(ka, (B, D), dtype=jnp.float32)
    pos = jax.random.normal(kp, (B, P, D), dtype=jnp.float32)
    neg = jax.random.normal(kn, (B, N, D), dtype=jnp.float32)

    loss = circle_loss2(anchor, pos, neg, m=0.15, gamma=1.0)
    jax.block_until_ready(loss)
    ref = _circle_loss2_ref(anchor, pos, neg, m=0.15, gamma=1.0)
    assert jnp.allclose(loss, ref, rtol=1e-3, atol=1e-3), (loss, ref)

    # --- check 2: lane-full shapes (MXU einsum path for the D-contraction) --
    B2, P2, N2, D2 = 8, 16, 16, 128
    ka2, kp2, kn2 = jax.random.split(key, 3)
    anchor2 = jax.random.normal(ka2, (B2, D2), dtype=jnp.float32)
    pos2 = jax.random.normal(kp2, (B2, P2, D2), dtype=jnp.float32)
    neg2 = jax.random.normal(kn2, (B2, N2, D2), dtype=jnp.float32)

    loss2 = circle_loss2(anchor2, pos2, neg2, m=0.25, gamma=2.0)
    jax.block_until_ready(loss2)
    ref2 = _circle_loss2_ref(anchor2, pos2, neg2, m=0.25, gamma=2.0)
    assert jnp.allclose(loss2, ref2, rtol=1e-3, atol=1e-3), (loss2, ref2)

    print("KERNEL_OK")
</pallas_src>

<mosaic_0001>
module attributes {stable_mosaic.version = 11 : i64} {
  func.func @_circle_loss2_kernel(%arg0: i32, %arg1: memref<8x32xf32, #tpu.memory_space<vmem>>, %arg2: memref<8x24x32xf32, #tpu.memory_space<vmem>>, %arg3: memref<1x1xf32, #tpu.memory_space<vmem>>) attributes {dimension_semantics = [#tpu.dimension_semantics<arbitrary>], iteration_bounds = array<i64: 1>, scalar_prefetch = 0 : i64, scratch_operands = 0 : i64, tpu.core_type = #tpu.core_type<tc>, window_params = [{transform_indices = @transform_0, window_bounds = array<i64: 8, 32>}, {transform_indices = @transform_1, window_bounds = array<i64: 8, 24, 32>}, {pipeline_mode = #tpu.pipeline_mode<synchronous>, transform_indices = @transform_2, window_bounds = array<i64: 1, 1>}]} {
    %c0 = arith.constant 0 : index
    %c0_0 = arith.constant 0 : index
    %0 = vector.load %arg1[%c0, %c0_0] : memref<8x32xf32, #tpu.memory_space<vmem>>, vector<8x32xf32>
    %c0_1 = arith.constant 0 : index
    %c0_2 = arith.constant 0 : index
    %c0_3 = arith.constant 0 : index
    %1 = vector.load %arg2[%c0_1, %c0_2, %c0_3] : memref<8x24x32xf32, #tpu.memory_space<vmem>>, vector<8x24x32xf32>
    %2 = arith.mulf %0, %0 : vector<8x32xf32>
    %cst = arith.constant dense<0.000000e+00> : vector<8xf32>
    %3 = vector.multi_reduction <add>, %2, %cst [1] : vector<8x32xf32> to vector<8xf32>
    %4 = vector.shape_cast %3 : vector<8xf32> to vector<8x1xf32>
    %cst_4 = arith.constant 1.000000e-24 : f32
    %5 = vector.broadcast %cst_4 : f32 to vector<8x1xf32>
    %6 = arith.maximumf %4, %5 : vector<8x1xf32>
    %7 = math.rsqrt %6 : vector<8x1xf32>
    %8 = arith.mulf %1, %1 : vector<8x24x32xf32>
    %cst_5 = arith.constant dense<0.000000e+00> : vector<8x24xf32>
    %9 = vector.multi_reduction <add>, %8, %cst_5 [2] : vector<8x24x32xf32> to vector<8x24xf32>
    %cst_6 = arith.constant 1.000000e-24 : f32
    %10 = vector.broadcast %cst_6 : f32 to vector<8x24xf32>
    %11 = arith.maximumf %9, %10 : vector<8x24xf32>
    %12 = math.rsqrt %11 : vector<8x24xf32>
    %13 = vector.shape_cast %0 : vector<8x32xf32> to vector<8x1x32xf32>
    %14 = vector.broadcast %13 : vector<8x1x32xf32> to vector<8x24x32xf32>
    %15 = arith.mulf %14, %1 : vector<8x24x32xf32>
    %cst_7 = arith.constant dense<0.000000e+00> : vector<8x24xf32>
    %16 = vector.multi_reduction <add>, %15, %cst_7 [2] : vector<8x24x32xf32> to vector<8x24xf32>
    %17 = vector.broadcast %7 : vector<8x1xf32> to vector<8x24xf32>
    %18 = arith.mulf %16, %17 : vector<8x24xf32>
    %19 = arith.mulf %18, %12 : vector<8x24xf32>
    %20 = vector.extract_strided_slice %19 {offsets = [0, 0], sizes = [8, 8], strides = [1, 1]} : vector<8x24xf32> to vector<8x8xf32>
    %21 = vector.extract_strided_slice %19 {offsets = [0, 8], sizes = [8, 16], strides = [1, 1]} : vector<8x24xf32> to vector<8x16xf32>
    %cst_8 = arith.constant 0.000000e+00 : f32
    %22 = vector.broadcast %cst_8 : f32 to vector<8x8xf32>
    %23 = arith.subf %22, %20 : vector<8x8xf32>
    %cst_9 = arith.constant 1.000000e+00 : f32
    %24 = vector.broadcast %cst_9 : f32 to vector<8x8xf32>
    %25 = arith.addf %23, %24 : vector<8x8xf32>
    %cst_10 = arith.constant 1.500000e-01 : f32
    %26 = vector.broadcast %cst_10 : f32 to vector<8x8xf32>
    %27 = arith.addf %25, %26 : vector<8x8xf32>
    %cst_11 = arith.constant 0.000000e+00 : f32
    %28 = vector.broadcast %cst_11 : f32 to vector<8x8xf32>
    %29 = arith.maximumf %27, %28 : vector<8x8xf32>
    %cst_12 = arith.constant 1.500000e-01 : f32
    %30 = vector.broadcast %cst_12 : f32 to vector<8x16xf32>
    %31 = arith.addf %21, %30 : vector<8x16xf32>
    %cst_13 = arith.constant 0.000000e+00 : f32
    %32 = vector.broadcast %cst_13 : f32 to vector<8x16xf32>
    %33 = arith.maximumf %31, %32 : vector<8x16xf32>
    %cst_14 = arith.constant 0.000000e+00 : f32
    %34 = vector.broadcast %cst_14 : f32 to vector<8x8xf32>
    %35 = arith.subf %34, %29 : vector<8x8xf32>
    %cst_15 = arith.constant 8.500000e-01 : f32
    %36 = vector.broadcast %cst_15 : f32 to vector<8x8xf32>
    %37 = arith.subf %20, %36 : vector<8x8xf32>
    %38 = arith.mulf %35, %37 : vector<8x8xf32>
    %cst_16 = arith.constant 1.000000e+00 : f32
    %39 = vector.broadcast %cst_16 : f32 to vector<8x8xf32>
    %40 = arith.mulf %38, %39 : vector<8x8xf32>
    %cst_17 = arith.constant 1.500000e-01 : f32
    %41 = vector.broadcast %cst_17 : f32 to vector<8x16xf32>
    %42 = arith.subf %21, %41 : vector<8x16xf32>
    %43 = arith.mulf %33, %42 : vector<8x16xf32>
    %cst_18 = arith.constant 1.000000e+00 : f32
    %44 = vector.broadcast %cst_18 : f32 to vector<8x16xf32>
    %45 = arith.mulf %43, %44 : vector<8x16xf32>
    %cst_19 = arith.constant dense<0xFF800000> : vector<8xf32>
    %46 = vector.multi_reduction <maximumf>, %40, %cst_19 [1] : vector<8x8xf32> to vector<8xf32>
    %47 = vector.shape_cast %46 : vector<8xf32> to vector<8x1xf32>
    %cst_20 = arith.constant 0.000000e+00 : f32
    %48 = vector.broadcast %cst_20 : f32 to vector<8x1xf32>
    %49 = arith.maximumf %47, %48 : vector<8x1xf32>
    %cst_21 = arith.constant 0.000000e+00 : f32
    %50 = vector.broadcast %cst_21 : f32 to vector<8x1xf32>
    %51 = arith.subf %50, %49 : vector<8x1xf32>
    %52 = math.exp %51 : vector<8x1xf32>
    %53 = vector.broadcast %49 : vector<8x1xf32> to vector<8x8xf32>
    %54 = arith.subf %40, %53 : vector<8x8xf32>
    %55 = math.exp %54 : vector<8x8xf32>
    %cst_22 = arith.constant dense<0.000000e+00> : vector<8xf32>
    %56 = vector.multi_reduction <add>, %55, %cst_22 [1] : vector<8x8xf32> to vector<8xf32>
    %57 = vector.shape_cast %56 : vector<8xf32> to vector<8x1xf32>
    %58 = arith.addf %52, %57 : vector<8x1xf32>
    %59 = math.log %58 : vector<8x1xf32>
    %60 = arith.addf %49, %59 : vector<8x1xf32>
    %cst_23 = arith.constant dense<0xFF800000> : vector<8xf32>
    %61 = vector.multi_reduction <maximumf>, %45, %cst_23 [1] : vector<8x16xf32> to vector<8xf32>
    %62 = vector.shape_cast %61 : vector<8xf32> to vector<8x1xf32>
    %cst_24 = arith.constant 0.000000e+00 : f32
    %63 = vector.broadcast %cst_24 : f32 to vector<8x1xf32>
    %64 = arith.maximumf %62, %63 : vector<8x1xf32>
    %cst_25 = arith.constant 0.000000e+00 : f32
    %65 = vector.broadcast %cst_25 : f32 to vector<8x1xf32>
    %66 = arith.subf %65, %64 : vector<8x1xf32>
    %67 = math.exp %66 : vector<8x1xf32>
    %68 = vector.broadcast %64 : vector<8x1xf32> to vector<8x16xf32>
    %69 = arith.subf %45, %68 : vector<8x16xf32>
    %70 = math.exp %69 : vector<8x16xf32>
    %cst_26 = arith.constant dense<0.000000e+00> : vector<8xf32>
    %71 = vector.multi_reduction <add>, %70, %cst_26 [1] : vector<8x16xf32> to vector<8xf32>
    %72 = vector.shape_cast %71 : vector<8xf32> to vector<8x1xf32>
    %73 = arith.addf %67, %72 : vector<8x1xf32>
    %74 = math.log %73 : vector<8x1xf32>
    %75 = arith.addf %64, %74 : vector<8x1xf32>
    %76 = arith.addf %60, %75 : vector<8x1xf32>
    %77 = vector.shape_cast %76 : vector<8x1xf32> to vector<1x8x1xf32>
    %cst_27 = arith.constant dense<0.000000e+00> : vector<1xf32>
    %78 = vector.multi_reduction <add>, %77, %cst_27 [1, 2] : vector<1x8x1xf32> to vector<1xf32>
    %79 = vector.shape_cast %78 : vector<1xf32> to vector<1x1x1xf32>
    %80 = vector.extract %79[0, 0, 0] : f32 from vector<1x1x1xf32>
    %81 = vector.broadcast %80 : f32 to vector<1x1xf32>
    %cst_28 = arith.constant 1.250000e-01 : f32
    %82 = vector.broadcast %cst_28 : f32 to vector<1x1xf32>
    %83 = arith.mulf %81, %82 : vector<1x1xf32>
    %c0_i32 = arith.constant 0 : i32
    %84 = arith.cmpi eq, %arg0, %c0_i32 : i32
    %85 = arith.extui %84 : i1 to i32
    %c0_i32_29 = arith.constant 0 : i32
    %86 = arith.cmpi ne, %85, %c0_i32_29 : i32
    scf.if %86 {
      %cst_34 = arith.constant 0.000000e+00 : f32
      %90 = vector.broadcast %cst_34 : f32 to vector<1x1xf32>
      %c0_35 = arith.constant 0 : index
      %c0_36 = arith.constant 0 : index
      %91 = vector.load %arg3[%c0_35, %c0_36] : memref<1x1xf32, #tpu.memory_space<vmem>>, vector<1x1xf32>
      tpu.vector_store %arg3[%c0_35, %c0_36], %90 {strides = array<i32>} : memref<1x1xf32, #tpu.memory_space<vmem>>, vector<1x1xf32>,
    } else {
    }
    %c0_30 = arith.constant 0 : index
    %c0_31 = arith.constant 0 : index
    %87 = vector.load %arg3[%c0_30, %c0_31] : memref<1x1xf32, #tpu.memory_space<vmem>>, vector<1x1xf32>
    %88 = arith.addf %87, %83 : vector<1x1xf32>
    %c0_32 = arith.constant 0 : index
    %c0_33 = arith.constant 0 : index
    %89 = vector.load %arg3[%c0_32, %c0_33] : memref<1x1xf32, #tpu.memory_space<vmem>>, vector<1x1xf32>
    tpu.vector_store %arg3[%c0_32, %c0_33], %88 {strides = array<i32>} : memref<1x1xf32, #tpu.memory_space<vmem>>, vector<1x1xf32>,
    return
  }
  func.func @transform_0(%arg0: i32) -> (i32, i32) {
    %c0_i32 = arith.constant 0 : i32
    %c0_i32_0 = arith.constant 0 : i32
    return %arg0, %c0_i32 : i32, i32
  }
  func.func @transform_1(%arg0: i32) -> (i32, i32, i32) {
    %c0_i32 = arith.constant 0 : i32
    %c0_i32_0 = arith.constant 0 : i32
    %c0_i32_1 = arith.constant 0 : i32
    return %arg0, %c0_i32, %c0_i32_0 : i32, i32, i32
  }
  func.func @transform_2(%arg0: i32) -> (i32, i32) {
    %c0_i32 = arith.constant 0 : i32
    %c0_i32_0 = arith.constant 0 : i32
    %c0_i32_1 = arith.constant 0 : i32
    return %c0_i32, %c0_i32_0 : i32, i32
  }
}

</mosaic_0001>

<bundles_post_ra>
// kernel: tpu_custom_call.1
= control target key start
LH: loop header
LB: loop body
LE: loop exit
PB: predicated region body
PF: predicated region fallthrough
CT: control target
= control target key end

     0   :  { %7 = vsyncpa [#allocation3], 0  ;;  %s2489_s0 = inlined_call_operand.hbm [shape: f32[8,32], index: 0, kind: input, shape index: {}]   ;;  %s2490_s1 = inlined_call_operand.hbm [shape: f32[8,24,32], index: 1, kind: input, shape index: {}]   ;;  %s2491_s2 = inlined_call_operand.hbm [shape: f32[1,1], index: 2, kind: output, shape index: {}]  }
   0x1   :  { %8 = vsyncpa [#allocation6], 0 }
   0x2   :  { %9 = vsyncpa [#allocation4], 0  ;;  %s15_s11 = sshll.u32 %s2489_s0, 4  ;;  %s1445_s12 = smov [#allocation2]   ;;  %s16_s11 = int_to_ptr.hbm [resolvable:$true] %s15_s11 }
   0x3   :  { %s17_s13 = sshll.u32 %s1445_s12, 4  ;;  %s25_s16 = sshll.u32 %s2490_s1, 4  ;;  %s18_s13 = int_to_ptr.vmem [resolvable:$true] %s17_s13  ;;  %s26_s16 = int_to_ptr.hbm [resolvable:$true] %s25_s16 }
   0x4   :  { %20 = dma.hbm_to_vmem [thread:$0]  %s16_s11, 128, %s18_s13, [#allocation3]  }
   0x5   :  { %s1446_s17 = smov [#allocation5]   ;;  %s1447_s19 = smov 128  }
   0x6   :  { %s27_s18 = sshll.u32 %s1446_s17, 4  ;;  %s1448_s20 = smov 8   ;;  %s28_s18 = int_to_ptr.vmem [resolvable:$true] %s27_s18 }
   0x7   :  { %33 = dma.hbm_to_vmem [thread:$0]  %s26_s16, 3072, %s28_s18, [#allocation6], %s1447_s19, %s1447_s19, %s1448_s20  }
   0x8   :  { %1439 = dma.done.wait [#allocation3], 128  }
   0x9   :  { %1440 = vsyncadd [#allocation3], 4294967168 }
   0xa   :  { %1441 = dma.done.wait [#allocation6], 3072  }
   0xb   :  { %1442 = vsyncadd [#allocation6], 4294964224  ;;  %v1473_v0 = vld [vmem:[#allocation5 + $0x18] sm:$0xff]  ;;  %vm68_vm0 = vcmask 261120   ;;  %v1475_v1 = vld [vmem:[#allocation5 + $0x8] sm:$0xff]  ;;  %s1451_s1 = smov [#allocation7]  }
   0xc   :  { %v1477_v2 = vld [vmem:[#allocation2] sm:$0xff]  ;;  %v86_v3 = vmul.f32 %v1473_v0, %v1473_v0  ;;  %v84_v4 = vmul.f32 %v1475_v1, %v1475_v1  ;;  %v1485_v6 = vld [vmem:[#allocation5 + $0x20] sm:$0xff]  ;;  %v1487_v7 = vld [vmem:[#allocation5 + $0x10] sm:$0xff]  ;;  %s1212_s21 = sshll.u32 %s1451_s1, 4  ;;  %s1214_s24 = sshll.u32 %s2491_s2, 4  ;;  %s1213_s21 = int_to_ptr.vmem [resolvable:$true] %s1212_s21  ;;  %s1215_s24 = int_to_ptr.hbm [resolvable:$true] %s1214_s24 }
   0xd   :  { %v67_v5 = vmul.f32 %v1477_v2, %v1477_v2  ;;  %v1492_v11 = vld [vmem:[#allocation5] sm:$0xff]  ;;  %v87_v12 = vmul.f32 %v1485_v6, %v1485_v6  ;;  %v85_v13 = vmul.f32 %v1487_v7, %v1487_v7  ;;  %v1503_v18 = vld [vmem:[#allocation5 + $0x38] sm:$0xff]  ;;  %v1505_v19 = vld [vmem:[#allocation5 + $0x30] sm:$0xff] }
   0xe   :  { %v116_v8 = vsel %vm68_vm0, %v86_v3, 0.0  ;;  %v110_v9 = vsel %vm68_vm0, %v84_v4, 0.0  ;;  %v83_v14 = vmul.f32 %v1492_v11, %v1492_v11  ;;  %v1507_v20 = vld [vmem:[#allocation5 + $0x28] sm:$0xff]  ;;  %v90_v21 = vmul.f32 %v1503_v18, %v1503_v18  ;;  %v1518_v27 = vld [vmem:[#allocation5 + $0x50] sm:$0xff]  ;;  %v1522_v29 = vld [vmem:[#allocation5 + $0x40] sm:$0xff] }
   0xf   :  { %v69_v10 = vsel %vm68_vm0, %v67_v5, 0.0  ;;  %117 = vadd.xlane.f32.xlu2 %v116_v8  ;;  %111 = vadd.xlane.f32.xlu1 %v110_v9  ;;  %v119_v15 = vsel %vm68_vm0, %v87_v12, 0.0  ;;  %v113_v16 = vsel %vm68_vm0, %v85_v13, 0.0  ;;  %v89_v22 = vmul.f32 %v1505_v19, %v1505_v19  ;;  %v1520_v28 = vld [vmem:[#allocation5 + $0x48] sm:$0xff]  ;;  %v1535_v37 = vld [vmem:[#allocation5 + $0x60] sm:$0xff]  ;;  %v1537_v38 = vld [vmem:[#allocation5 + $0x58] sm:$0xff] }
  0x10   :  { %70 = vadd.xlane.f32.xlu0 %v69_v10  ;;  %v107_v17 = vsel %vm68_vm0, %v83_v14, 0.0  ;;  %v88_v23 = vmul.f32 %v1507_v20, %v1507_v20  ;;  %v128_v24 = vsel %vm68_vm0, %v90_v21, 0.0  ;;  %v93_v30 = vmul.f32 %v1518_v27, %v1518_v27  ;;  %v1533_v36 = vld [vmem:[#allocation5 + $0x68] sm:$0xff]  ;;  %v1548_v45 = vld [vmem:[#allocation5 + $0x80] sm:$0xff]  ;;  %v1550_v46 = vld [vmem:[#allocation5 + $0x78] sm:$0xff] }
  0x11   :  { %v125_v25 = vsel %vm68_vm0, %v89_v22, 0.0  ;;  %v92_v31 = vmul.f32 %v1520_v28, %v1520_v28  ;;  %v91_v32 = vmul.f32 %v1522_v29, %v1522_v29  ;;  %v96_v39 = vmul.f32 %v1533_v36, %v1533_v36  ;;  %v1552_v47 = vld [vmem:[#allocation5 + $0x70] sm:$0xff]  ;;  %v1563_v54 = vld [vmem:[#allocation5 + $0x98] sm:$0xff]  ;;  %v1567_v56 = vld [vmem:[#allocation5 + $0x88] sm:$0xff] }
  0x12   :  { %v122_v26 = vsel %vm68_vm0, %v88_v23, 0.0  ;;  %v137_v33 = vsel %vm68_vm0, %v93_v30, 0.0  ;;  %v95_v40 = vmul.f32 %v1535_v37, %v1535_v37  ;;  %v94_v41 = vmul.f32 %v1537_v38, %v1537_v38  ;;  %v1565_v55 = vld [vmem:[#allocation5 + $0x90] sm:$0xff]  ;;  %v1580_v3 = vld [vmem:[#allocation5 + $0xa8] sm:$0xff]  ;;  %v1582_v4 = vld [vmem:[#allocation5 + $0xa0] sm:$0xff] }
  0x13   :  { %v134_v34 = vsel %vm68_vm0, %v92_v31, 0.0  ;;  %v131_v35 = vsel %vm68_vm0, %v91_v32, 0.0  ;;  %v146_v42 = vsel %vm68_vm0, %v96_v39, 0.0  ;;  %v99_v48 = vmul.f32 %v1548_v45, %v1548_v45  ;;  %v1578_v63 = vld [vmem:[#allocation5 + $0xb0] sm:$0xff] }
  0x14   :  { %v143_v43 = vsel %vm68_vm0, %v95_v40, 0.0  ;;  %v140_v44 = vsel %vm68_vm0, %v94_v41, 0.0  ;;  %v98_v49 = vmul.f32 %v1550_v46, %v1550_v46  ;;  %v97_v50 = vmul.f32 %v1552_v47, %v1552_v47 }
  0x15   :  { %v155_v51 = vsel %vm68_vm0, %v99_v48, 0.0  ;;  %v102_v57 = vmul.f32 %v1563_v54, %v1563_v54  ;;  %v101_v58 = vmul.f32 %v1565_v55, %v1565_v55  ;;  %v100_v59 = vmul.f32 %v1567_v56, %v1567_v56 }
  0x16   :  { %v152_v52 = vsel %vm68_vm0, %v98_v49, 0.0  ;;  %v149_v53 = vsel %vm68_vm0, %v97_v50, 0.0  ;;  %v105_v5 = vmul.f32 %v1578_v63, %v1578_v63  ;;  %v104_v8 = vmul.f32 %v1580_v3, %v1580_v3 }
  0x17   :  { %120 = vadd.xlane.f32.xlu2 %v119_v15  ;;  %114 = vadd.xlane.f32.xlu1 %v113_v16  ;;  %v164_v60 = vsel %vm68_vm0, %v102_v57, 0.0  ;;  %v161_v61 = vsel %vm68_vm0, %v101_v58, 0.0  ;;  %v158_v62 = vsel %vm68_vm0, %v100_v59, 0.0  ;;  %v103_v9 = vmul.f32 %v1582_v4, %v1582_v4  ;;  %v1594_v15 = vld [vmem:[#allocation5 + $0xb8] sm:$0xff] }
  0x18   :  { %108 = vadd.xlane.f32.xlu0 %v107_v17  ;;  %v173_v10 = vsel %vm68_vm0, %v105_v5, 0.0  ;;  %v170_v12 = vsel %vm68_vm0, %v104_v8, 0.0  ;;  %v451_v13 = vperm.slane %v1477_v2, 0  ;;  %v444_v21 = vrot.slane %v1477_v2, 1 }
  0x19   :  { %v167_v14 = vsel %vm68_vm0, %v103_v9, 0.0  ;;  %v106_v22 = vmul.f32 %v1594_v15, %v1594_v15 }
  0x1a   :  { %v468_v16 = vmul.f32 %v451_v13, %v1475_v1  ;;  %v467_v17 = vmul.f32 %v451_v13, %v1492_v11  ;;  %v445_v11 = vrot.slane %v1477_v2, 2  ;;  %v469_v31 = vmul.f32 %v451_v13, %v1487_v7 }
  0x1c   :  { %v494_v23 = vsel %vm68_vm0, %v468_v16, 0.0 }
  0x1f   :  { %129 = vadd.xlane.f32.xlu2 %v128_v24  ;;  %126 = vadd.xlane.f32.xlu1 %v125_v25  ;;  %v491_v24 = vsel %vm68_vm0, %v467_v17, 0.0  ;;  %v452_v25 = vperm.slane %v444_v21, 0 }
  0x20   :  { %123 = vadd.xlane.f32.xlu0 %v122_v26  ;;  %v176_v26 = vsel %vm68_vm0, %v106_v22, 0.0 }
  0x21   :  { %v471_v30 = vmul.f32 %v452_v25, %v1485_v6  ;;  %v470_v1 = vmul.f32 %v452_v25, %v1473_v0  ;;  %v446_v0 = vrot.slane %v1477_v2, 3  ;;  %v472_v40 = vmul.f32 %v452_v25, %v1507_v20 }
  0x23   :  { %v503_v32 = vsel %vm68_vm0, %v471_v30, 0.0 }
  0x27   :  { %138 = vadd.xlane.f32.xlu2 %v137_v33  ;;  %135 = vadd.xlane.f32.xlu1 %v134_v34  ;;  %v500_v33 = vsel %vm68_vm0, %v470_v1, 0.0  ;;  %v453_v34 = vperm.slane %v445_v11, 0 }
  0x28   :  { %132 = vadd.xlane.f32.xlu0 %v131_v35  ;;  %v497_v35 = vsel %vm68_vm0, %v469_v31, 0.0 }
  0x29   :  { %v474_v39 = vmul.f32 %v453_v34, %v1503_v18  ;;  %v473_v6 = vmul.f32 %v453_v34, %v1505_v19  ;;  %v447_v19 = vrot.slane %v1477_v2, 4  ;;  %v475_v48 = vmul.f32 %v453_v34, %v1522_v29 }
  0x2b   :  { %v512_v7 = vsel %vm68_vm0, %v474_v39, 0.0  ;;  %v509_v41 = vsel %vm68_vm0, %v473_v6, 0.0  ;;  %v455_v50 = vperm.slane %v447_v19, 0 }
  0x2f   :  { %147 = vadd.xlane.f32.xlu2 %v146_v42  ;;  %144 = vadd.xlane.f32.xlu1 %v143_v43  ;;  %v454_v42 = vperm.slane %v446_v0, 0  ;;  %v506_v43 = vsel %vm68_vm0, %v472_v40, 0.0 }
  0x30   :  { %141 = vadd.xlane.f32.xlu0 %v140_v44 }
  0x31   :  { %v477_v44 = vmul.f32 %v454_v42, %v1518_v27  ;;  %v476_v18 = vmul.f32 %v454_v42, %v1520_v28  ;;  %v479_v27 = vmul.f32 %v455_v50, %v1535_v37  ;;  %v448_v28 = vrot.slane %v1477_v2, 5 }
  0x32   :  { %v449_v37 = vrot.slane %v1477_v2, 6 }
  0x33   :  { %v521_v20 = vsel %vm68_vm0, %v477_v44, 0.0  ;;  %v518_v49 = vsel %vm68_vm0, %v476_v18, 0.0  ;;  %v527_v57 = vsel %vm68_vm0, %v479_v27, 0.0  ;;  %v456_v58 = vperm.slane %v448_v28, 0 }
  0x34   :  { %v457_v5 = vperm.slane %v449_v37, 0 }
  0x36   :  { %v486_v9 = vmul.f32 %v457_v5, %v1563_v54 }
  0x37   :  { %156 = vadd.xlane.f32.xlu2 %v155_v51  ;;  %153 = vadd.xlane.f32.xlu1 %v152_v52  ;;  %v515_v51 = vsel %vm68_vm0, %v475_v48, 0.0  ;;  %v480_v52 = vmul.f32 %v455_v50, %v1533_v36  ;;  %v482_v36 = vmul.f32 %v456_v58, %v1550_v46  ;;  %v450_v46 = vrot.slane %v1477_v2, 7 }
  0x38   :  { %150 = vadd.xlane.f32.xlu0 %v149_v53  ;;  %v478_v53 = vmul.f32 %v454_v42, %v1537_v38 }
  0x39   :  { %v530_v29 = vsel %vm68_vm0, %v480_v52, 0.0  ;;  %v458_v13 = vperm.slane %v450_v46, 0 }
  0x3a   :  { %v524_v59 = vsel %vm68_vm0, %v478_v53, 0.0 }
  0x3b   :  { %v489_v16 = vmul.f32 %v458_v13, %v1578_v63  ;;  %v488_v54 = vmul.f32 %v458_v13, %v1580_v3 }
  0x3d   :  { %v554_v22 = vsel %vm68_vm0, %v488_v54, 0.0 }
  0x3f   :  { %165 = vadd.xlane.f32.xlu2 %v164_v60  ;;  %162 = vadd.xlane.f32.xlu1 %v161_v61  ;;  %v483_v60 = vmul.f32 %v456_v58, %v1548_v45  ;;  %v481_v61 = vmul.f32 %v455_v50, %v1552_v47  ;;  %v485_v45 = vmul.f32 %v457_v5, %v1565_v55  ;;  %v548_v47 = vsel %vm68_vm0, %v486_v9, 0.0 }
  0x40   :  { %159 = vadd.xlane.f32.xlu0 %v158_v62  ;;  %v536_v62 = vsel %vm68_vm0, %v482_v36, 0.0  ;;  %v487_v55 = vmul.f32 %v457_v5, %v1582_v4 }
  0x41   :  { %v539_v38 = vsel %vm68_vm0, %v483_v60, 0.0  ;;  %v533_v8 = vsel %vm68_vm0, %v481_v61, 0.0 }
  0x47   :  { %174 = vadd.xlane.f32.xlu2 %v173_v10  ;;  %171 = vadd.xlane.f32.xlu1 %v170_v12  ;;  %v484_v10 = vmul.f32 %v456_v58, %v1567_v56  ;;  %v545_v12 = vsel %vm68_vm0, %v485_v45, 0.0  ;;  %v557_v56 = vsel %vm68_vm0, %v489_v16, 0.0 }
  0x48   :  { %168 = vadd.xlane.f32.xlu0 %v167_v14 }
  0x49   :  { %v542_v14 = vsel %vm68_vm0, %v484_v10, 0.0 }
  0x4f   :  { %495 = vadd.xlane.f32.xlu2 %v494_v23  ;;  %492 = vadd.xlane.f32.xlu1 %v491_v24  ;;  %v551_v23 = vsel %vm68_vm0, %v487_v55, 0.0  ;;  %v490_v24 = vmul.f32 %v458_v13, %v1594_v15 }
  0x50   :  { %177 = vadd.xlane.f32.xlu0 %v176_v26 }
  0x51   :  { %v560_v3 = vsel %vm68_vm0, %v490_v24, 0.0 }
  0x57   :  { %504 = vadd.xlane.f32.xlu2 %v503_v32  ;;  %501 = vadd.xlane.f32.xlu1 %v500_v33 }
  0x58   :  { %498 = vadd.xlane.f32.xlu0 %v497_v35 }
  0x5f   :  { %513 = vadd.xlane.f32.xlu2 %v512_v7  ;;  %510 = vadd.xlane.f32.xlu1 %v509_v41 }
  0x60   :  { %507 = vadd.xlane.f32.xlu0 %v506_v43 }
  0x67   :  { %522 = vadd.xlane.f32.xlu2 %v521_v20  ;;  %519 = vadd.xlane.f32.xlu1 %v518_v49 }
  0x68   :  { %516 = vadd.xlane.f32.xlu0 %v515_v51 }
  0x6f   :  { %531 = vadd.xlane.f32.xlu2 %v530_v29  ;;  %528 = vadd.xlane.f32.xlu1 %v527_v57 }
  0x70   :  { %525 = vadd.xlane.f32.xlu0 %v524_v59 }
  0x77   :  { %540 = vadd.xlane.f32.xlu2 %v539_v38  ;;  %537 = vadd.xlane.f32.xlu1 %v536_v62 }
  0x78   :  { %534 = vadd.xlane.f32.xlu0 %v533_v8 }
  0x7f   :  { %549 = vadd.xlane.f32.xlu2 %v548_v47  ;;  %546 = vadd.xlane.f32.xlu1 %v545_v12  ;;  %v1449_v47 = vmov 0  }
  0x80   :  { %543 = vadd.xlane.f32.xlu0 %v542_v14  ;;  %1258 = vset.pattern.permute.xlu1 %v1449_v47 }
  0x81   :  { %1259 = vset.pattern.permute.xlu2 %v1449_v47  ;;  %1260 = vset.pattern.permute.xlu0 %v1449_v47 }
  0x82   :  { %v118_v17 = vpop.xlane.xlu2 %117  ;;  %v112_v2 = vpop.xlane.xlu1 %111 }
  0x83   :  { %v71_v21 = vpop.xlane.xlu0 %70  ;;  %v1658_v34 = vmax.f32 %v112_v2, 1e-24  ;;  %v1668_v0 = vmax.f32 %v118_v17, 1e-24 }
  0x84   :  { %v72_v33 = vmax.f32 %v71_v21, 1e-24 }
  0x85   :  { %vm239_vm3 = vweird.f32 %v1668_v0  ;;  %vm219_vm5 = vweird.f32 %v1658_v34 }
  0x86   :  { %1261 = vrsqrt.f32 %v72_v33  ;;  %vm79_vm1 = vweird.f32 %v72_v33 }
  0x87   :  { %558 = vadd.xlane.f32.xlu2 %v557_v56  ;;  %555 = vadd.xlane.f32.xlu1 %v554_v22  ;;  %1263 = vrsqrt.f32 %v1658_v34 }
  0x88   :  { %552 = vadd.xlane.f32.xlu0 %v551_v23 }
  0x8a   :  { %v121_v25 = vpop.xlane.xlu2 %120  ;;  %v115_v63 = vpop.xlane.xlu1 %114 }
  0x8b   :  { %v109_v26 = vpop.xlane.xlu0 %108  ;;  %v1670_v40 = vmax.f32 %v121_v25, 1e-24  ;;  %v1679_v42 = vmax.f32 %v115_v63, 1e-24 }
  0x8c   :  { %v1664_v39 = vmax.f32 %v109_v26, 1e-24  ;;  %v1672_v7 = vpop.eup %1261 }
  0x8d   :  { %v74_v41 = vmul.f32 %v1672_v7, %v72_v33  ;;  %v1687_v19 = vpop.eup %1263  ;;  %vm80_vm2 = vweird.f32 %v1672_v7  ;;  %vm249_vm10 = vweird.f32 %v1670_v40  ;;  %vm229_vm14 = vweird.f32 %v1679_v42 }
  0x8e   :  { %1265 = vrsqrt.f32 %v1664_v39  ;;  %v214_v52 = vmul.f32 %v1687_v19, %v1658_v34  ;;  %vm1738_vm4 = vmor %vm79_vm1, %vm80_vm2  ;;  %vm209_vm6 = vweird.f32 %v1664_v39  ;;  %vm220_vm7 = vweird.f32 %v1687_v19 }
  0x8f   :  { %1267 = vrsqrt.f32 %v1668_v0  ;;  %v75_v20 = vmul.f32 %v1672_v7, %v74_v41  ;;  %vm1786_vm11 = vmor %vm219_vm5, %vm220_vm7 }
  0x90   :  { %561 = vadd.xlane.f32.xlu0 %v560_v3  ;;  %1269 = vrsqrt.f32 %v1670_v40  ;;  %v215_v36 = vmul.f32 %v1687_v19, %v214_v52 }
  0x91   :  { %1271 = vrsqrt.f32 %v1679_v42  ;;  %v76_v29 = vmul.f32 0.5, %v75_v20 }
  0x92   :  { %v130_v4 = vpop.xlane.xlu2 %129  ;;  %v127_v30 = vpop.xlane.xlu1 %126  ;;  %v216_v45 = vmul.f32 0.5, %v215_v36 }
  0x93   :  { %v124_v1 = vpop.xlane.xlu0 %123  ;;  %v1692_v49 = vmax.f32 %v130_v4, 1e-24  ;;  %v1701_v27 = vmax.f32 %v127_v30, 1e-24  ;;  %v77_v5 = vsub.f32 1.5, %v76_v29 }
  0x94   :  { %v1689_v48 = vpop.eup %1265  ;;  %v1708_v57 = vmax.f32 %v124_v1, 1e-24  ;;  %v217_v22 = vsub.f32 1.5, %v216_v45 }
  0x95   :  { %v1694_v50 = vpop.eup %1267  ;;  %v204_v28 = vmul.f32 %v1689_v48, %v1664_v39  ;;  %1273 = vrsqrt.f32 %v1692_v49  ;;  %v78_v14 = vmul.f32 %v1672_v7, %v77_v5  ;;  %vm210_vm8 = vweird.f32 %v1689_v48 }
  0x96   :  { %v1697_v51 = vpop.eup %1269  ;;  %v234_v53 = vmul.f32 %v1694_v50, %v1668_v0  ;;  %1275 = vrsqrt.f32 %v1701_v27  ;;  %v1777_v33 = vmul.f32 %v1687_v19, %v217_v22  ;;  %vm240_vm9 = vweird.f32 %v1694_v50  ;;  %vm1802_vm13 = vmor %vm209_vm6, %vm210_vm8 }
  0x97   :  { %v244_v58 = vmul.f32 %v1697_v51, %v1670_v40  ;;  %v1720_v61 = vpop.eup %1271  ;;  %v205_v38 = vmul.f32 %v1689_v48, %v204_v28  ;;  %1277 = vrsqrt.f32 %v1708_v57  ;;  %v1767_v30 = vsel %vm1738_vm4, %v1672_v7, %v78_v14  ;;  %vm1818_vm15 = vmor %vm239_vm3, %vm240_vm9 }
  0x98   :  { %v235_v62 = vmul.f32 %v1694_v50, %v234_v53  ;;  %v224_v46 = vmul.f32 %v1720_v61, %v1679_v42  ;;  %vm250_vm12 = vweird.f32 %v1697_v51  ;;  %v1796_v28 = vperm.slane %v1767_v30, 0 }
  0x99   :  { %v245_v8 = vmul.f32 %v1697_v51, %v244_v58  ;;  %v206_v10 = vmul.f32 0.5, %v205_v38  ;;  %vm279_vm0 = vweird.f32 %v1692_v49  ;;  %vm1836_vm1 = vmor %vm249_vm10, %vm250_vm12  ;;  %v1849_v14 = vperm.slane %v1767_v30, 1 }
  0x9a   :  { %v1654_v11 = vpop.xlane.xlu2 %138  ;;  %v136_v31 = vpop.xlane.xlu1 %135  ;;  %v236_v13 = vmul.f32 0.5, %v235_v62  ;;  %v225_v23 = vmul.f32 %v1720_v61, %v224_v46  ;;  %vm259_vm2 = vweird.f32 %v1708_v57  ;;  %vm230_vm3 = vweird.f32 %v1720_v61 }
  0x9b   :  { %v1656_v32 = vpop.xlane.xlu0 %132  ;;  %v1726_v9 = vpop.eup %1273  ;;  %v1734_v16 = vmax.f32 %v136_v31, 1e-24  ;;  %v246_v55 = vmul.f32 0.5, %v245_v8  ;;  %v1745_v2 = vmax.f32 %v1654_v11, 1e-24  ;;  %v207_v26 = vsub.f32 1.5, %v206_v10  ;;  %vm231_vm8 = vmor %vm229_vm14, %vm230_vm3 }
  0x9c   :  { %v1731_v12 = vpop.eup %1275  ;;  %v274_v17 = vmul.f32 %v1726_v9, %v1692_v49  ;;  %v1754_v24 = vmax.f32 %v1656_v32, 1e-24  ;;  %v237_v4 = vsub.f32 1.5, %v236_v13  ;;  %v226_v32 = vmul.f32 0.5, %v225_v23 }
  0x9d   :  { %v1749_v56 = vpop.eup %1277  ;;  %v264_v3 = vmul.f32 %v1731_v12, %v1701_v27  ;;  %1279 = vrsqrt.f32 %v1734_v16  ;;  %v247_v1 = vsub.f32 1.5, %v246_v55  ;;  %v208_v20 = vmul.f32 %v1689_v48, %v207_v26 }
  0x9e   :  { %v275_v11 = vmul.f32 %v1726_v9, %v274_v17  ;;  %v254_v31 = vmul.f32 %v1749_v56, %v1708_v57  ;;  %1281 = vrsqrt.f32 %v1745_v2  ;;  %v1807_v53 = vmul.f32 %v1694_v50, %v237_v4 }
  0x9f   :  { %1283 = vrsqrt.f32 %v1754_v24  ;;  %v265_v7 = vmul.f32 %v1731_v12, %v264_v3  ;;  %v1812_v36 = vmul.f32 %v1697_v51, %v247_v1  ;;  %v227_v62 = vsub.f32 1.5, %v226_v32 }
  0xa0   :  { %v276_v29 = vmul.f32 0.5, %v275_v11  ;;  %v212_v13 = vsel %vm1802_vm13, %v1689_v48, %v208_v20  ;;  %vm269_vm4 = vweird.f32 %v1701_v27  ;;  %v1877_v4 = vperm.slane %v1767_v30, 2 }
  0xa1   :  { %v266_v10 = vmul.f32 0.5, %v265_v7  ;;  %vm280_vm5 = vweird.f32 %v1726_v9  ;;  %vm270_vm6 = vweird.f32 %v1731_v12  ;;  %vm260_vm7 = vweird.f32 %v1749_v56 }
  0xa2   :  { %v1660_v35 = vpop.xlane.xlu2 %147  ;;  %v1662_v15 = vpop.xlane.xlu1 %144  ;;  %v277_v48 = vsub.f32 1.5, %v276_v29  ;;  %vm1912_vm9 = vmor %vm279_vm0, %vm280_vm5  ;;  %v1926_v49 = vperm.slane %v1767_v30, 3  ;;  %vm289_vm10 = vweird.f32 %v1754_v24  ;;  %vm299_vm13 = vweird.f32 %v1734_v16 }
  0xa3   :  { %v1666_v6 = vpop.xlane.xlu0 %141  ;;  %v1793_v52 = vmax.f32 %v1662_v15, 1e-24  ;;  %v255_v15 = vmul.f32 %v1749_v56, %v254_v31  ;;  %v1822_v38 = vpop.eup %1279  ;;  %v1872_v26 = vmax.f32 %v1660_v35, 1e-24  ;;  %v267_v1 = vsub.f32 1.5, %v266_v10  ;;  %vm1940_vm12 = vmor %vm269_vm4, %vm270_vm6 }
  0xa4   :  { %v1840_v46 = vpop.eup %1281  ;;  %v1843_v47 = vmax.f32 %v1666_v6, 1e-24  ;;  %v242_v6 = vsel %vm1818_vm15, %v1694_v50, %v1807_v53  ;;  %v294_v22 = vmul.f32 %v1822_v38, %v1734_v16  ;;  %v228_v50 = vmul.f32 %v1720_v61, %v227_v62  ;;  %vm1955_vm14 = vmor %vm259_vm2, %vm260_vm7 }
  0xa5   :  { %v1851_v54 = vpop.eup %1283  ;;  %1285 = vrsqrt.f32 %v1793_v52  ;;  %v256_v17 = vmul.f32 0.5, %v255_v15  ;;  %v304_v11 = vmul.f32 %v1840_v46, %v1745_v2  ;;  %v1891_v53 = vmul.f32 %v1726_v9, %v277_v48 }
  0xa6   :  { %v284_v31 = vmul.f32 %v1851_v54, %v1754_v24  ;;  %1287 = vrsqrt.f32 %v1843_v47  ;;  %v295_v20 = vmul.f32 %v1822_v38, %v294_v22  ;;  %vm300_vm15 = vweird.f32 %v1822_v38 }
  0xa7   :  { %v257_v7 = vsub.f32 1.5, %v256_v17  ;;  %1289 = vrsqrt.f32 %v1872_v26  ;;  %v305_v62 = vmul.f32 %v1840_v46, %v304_v11  ;;  %v232_v17 = vsel %vm231_vm8, %v1720_v61, %v228_v50  ;;  %vm2011_vm4 = vmor %vm299_vm13, %vm300_vm15 }
  0xa8   :  { %vm290_vm0 = vweird.f32 %v1851_v54  ;;  %vm319_vm2 = vweird.f32 %v1843_v47  ;;  %vm329_vm3 = vweird.f32 %v1793_v52  ;;  %vm309_vm13 = vweird.f32 %v1745_v2 }
  0xa9   :  { %vm2024_vm5 = vmor %vm289_vm10, %vm290_vm0 }
  0xaa   :  { %v1681_v43 = vpop.xlane.xlu2 %156  ;;  %v1683_v44 = vpop.xlane.xlu1 %153 }
  0xab   :  { %v1685_v18 = vpop.xlane.xlu0 %150  ;;  %v1885_v32 = vmax.f32 %v1683_v44, 1e-24  ;;  %v1894_v29 = vpop.eup %1285 }
  0xac   :  { %v1898_v44 = vmax.f32 %v1685_v18, 1e-24  ;;  %v1919_v22 = vpop.eup %1287  ;;  %v324_v11 = vmul.f32 %v1894_v29, %v1793_v52  ;;  %vm330_vm6 = vweird.f32 %v1894_v29 }
  0xad   :  { %1291 = vrsqrt.f32 %v1885_v32  ;;  %vm320_vm7 = vweird.f32 %v1919_v22  ;;  %vm2071_vm8 = vmor %vm329_vm3, %vm330_vm6  ;;  %vm339_vm3 = vweird.f32 %v1872_v26 }
  0xae   :  { %1293 = vrsqrt.f32 %v1898_v44  ;;  %vm349_vm10 = vweird.f32 %v1898_v44 }
  0xb2   :  { %v1712_v59 = vpop.xlane.xlu2 %165  ;;  %v1714_v60 = vpop.xlane.xlu1 %162 }
  0xb3   :  { %2492 = vst [vmem:[#allocation11_spill] sm:$0xff] %v1712_v59  ;;  %v1718_v37 = vpop.xlane.xlu0 %159  ;;  %v1973_v50 = vmax.f32 %v1714_v60, 1e-24 }
  0xb5   :  { %1295 = vrsqrt.f32 %v1973_v50  ;;  %vm389_vm6 = vweird.f32 %v1973_v50 }
  0xba   :  { %v1747_v21 = vpop.xlane.xlu1 %171  ;;  %v1756_v25 = vpop.xlane.xlu2 %174 }
  0xbb   :  { %2495 = vst [vmem:[#allocation12_spill] sm:$0xff] %v1756_v25  ;;  %v1758_v63 = vpop.xlane.xlu0 %168 }
  0xc2   :  { %v493_v58 = vpop.xlane.xlu1 %492  ;;  %v1855_v40 = vpop.xlane.xlu2 %495 }
  0xc3   :  { %v580_v8 = vmul.f32 %v1796_v28, %v493_v58  ;;  %v1830_v45 = vpop.xlane.xlu0 %177 }
  0xc5   :  { %v1857_v55 = vmul.f32 %v580_v8, %v212_v13  ;;  %v285_v8 = vmul.f32 %v1851_v54, %v284_v31  ;;  %v268_v13 = vmul.f32 %v1731_v12, %v267_v1 }
  0xc7   :  { %v628_v3 = vsub.f32 0.0, %v1857_v55  ;;  %v1225_v57 = vadd.f32 -0.85, %v1857_v55  ;;  %v1980_v55 = vmax.f32 %v1681_v43, 1e-24 }
  0xc9   :  { %v636_v35 = vadd.f32 1.0, %v628_v3  ;;  %v296_v3 = vmul.f32 0.5, %v295_v20  ;;  %v1945_v20 = vmul.f32 0.5, %v305_v62  ;;  %1297 = vrsqrt.f32 %v1980_v55 }
  0xca   :  { %v502_v34 = vpop.xlane.xlu1 %501  ;;  %v1930_v1 = vpop.xlane.xlu2 %504 }
  0xcb   :  { %v644_v15 = vadd.f32 0.15, %v636_v35  ;;  %v583_v58 = vmul.f32 %v1849_v14, %v502_v34  ;;  %v499_v39 = vpop.xlane.xlu0 %498  ;;  %v258_v35 = vmul.f32 %v1749_v56, %v257_v7  ;;  %v286_v34 = vmul.f32 0.5, %v285_v8  ;;  %v1960_v7 = vpop.eup %1289 }
  0xcc   :  { %v582_v10 = vmul.f32 %v1796_v28, %v499_v39  ;;  %v325_v8 = vmul.f32 %v1894_v29, %v324_v11  ;;  %v334_v60 = vmul.f32 %v1960_v7, %v1872_v26 }
  0xcd   :  { %v652_v42 = vmax.f32 %v644_v15, 0.0  ;;  %v607_v48 = vmul.f32 %v583_v58, %v242_v6  ;;  %v272_v15 = vsel %vm1940_vm12, %v1731_v12, %v268_v13  ;;  %v314_v58 = vmul.f32 %v1919_v22, %v1843_v47  ;;  %vm2088_vm12 = vmor %vm319_vm2, %vm320_vm7 }
  0xce   :  { %v1923_v31 = vmul.f32 %v582_v10, %v232_v17  ;;  %v297_v12 = vsub.f32 1.5, %v296_v3  ;;  %v1968_v13 = vperm.slane %v1767_v30, 4  ;;  %v1970_v17 = vpop.eup %1291  ;;  %v287_v11 = vsub.f32 1.5, %v286_v34 }
  0xcf   :  { %v629_v6 = vsub.f32 0.0, %v607_v48  ;;  %v692_v62 = vsub.f32 0.0, %v652_v42  ;;  %v262_v42 = vsel %vm1955_vm14, %v1749_v56, %v258_v35  ;;  %v1985_v25 = vpop.eup %1293  ;;  %v326_v27 = vmul.f32 0.5, %v325_v8 }
  0xd0   :  { %v354_v56 = vmul.f32 %v1970_v17, %v1885_v32  ;;  %v298_v43 = vmul.f32 %v1822_v38, %v297_v12  ;;  %v1226_v34 = vadd.f32 -0.85, %v607_v48  ;;  %vm310_vm14 = vweird.f32 %v1840_v46 }
  0xd1   :  { %v637_v39 = vadd.f32 1.0, %v629_v6  ;;  %v1983_v5 = vmul.f32 %v1225_v57, %v692_v62  ;;  %vm360_vm15 = vweird.f32 %v1970_v17  ;;  %vm350_vm0 = vweird.f32 %v1985_v25 }
  0xd2   :  { %v511_v10 = vpop.xlane.xlu1 %510  ;;  %v2005_v12 = vpop.xlane.xlu2 %513  ;;  %vm340_vm7 = vweird.f32 %v1960_v7 }
  0xd3   :  { %v645_v61 = vadd.f32 0.15, %v637_v39  ;;  %v586_v6 = vmul.f32 %v1877_v4, %v511_v10  ;;  %v508_v3 = vpop.xlane.xlu0 %507  ;;  %v315_v39 = vmul.f32 %v1919_v22, %v314_v58  ;;  %757 = vperm.xlu1 %1258, %v1983_v5   ;;  %v587_v52 = vmul.f32 %v1877_v4, %v2005_v12 }
  0xd4   :  { %v585_v23 = vmul.f32 %v1849_v14, %v508_v3  ;;  %v335_v3 = vmul.f32 %v1960_v7, %v334_v60  ;;  %v302_v60 = vsel %vm2011_vm4, %v1822_v38, %v298_v43  ;;  %v2151_v12 = vperm.slane %v1767_v30, 6 }
  0xd5   :  { %v653_v10 = vmax.f32 %v645_v61, 0.0  ;;  %v610_v59 = vmul.f32 %v586_v6, %v272_v15  ;;  %v307_v61 = vsub.f32 1.5, %v1945_v20  ;;  %v581_v15 = vmul.f32 %v1796_v28, %v1855_v40 }
  0xd6   :  { %v1992_v35 = vmul.f32 %v585_v23, %v262_v42  ;;  %v344_v23 = vmul.f32 %v1985_v25, %v1898_v44  ;;  %v316_v58 = vmul.f32 0.5, %v315_v39  ;;  %v288_v6 = vmul.f32 %v1851_v54, %v287_v11 }
  0xd7   :  { %v630_v62 = vsub.f32 0.0, %v610_v59  ;;  %v693_v57 = vsub.f32 0.0, %v653_v10  ;;  %v327_v10 = vsub.f32 1.5, %v326_v27  ;;  %v355_v28 = vmul.f32 %v1970_v17, %v354_v56 }
  0xd8   :  { %v2030_v11 = vmax.f32 %v1747_v21, 1e-24  ;;  %v345_v24 = vmul.f32 %v1985_v25, %v344_v23  ;;  %v317_v38 = vsub.f32 1.5, %v316_v58  ;;  %v292_v48 = vsel %vm2024_vm5, %v1851_v54, %v288_v6 }
  0xd9   :  { %v638_v8 = vadd.f32 1.0, %v630_v62  ;;  %v2016_v42 = vmul.f32 %v1226_v34, %v693_v57  ;;  %v2514_v34 = vsel %vm1786_vm11, %v1687_v19, %v1777_v33  ;;  %v2045_v57 = vpop.eup %1295  ;;  %v356_v41 = vmul.f32 0.5, %v355_v28 }
  0xda   :  { %v520_v40 = vpop.xlane.xlu1 %519  ;;  %v605_v62 = vmul.f32 %v581_v15, %v2514_v34  ;;  %v2050_v23 = vpop.eup %1297  ;;  %v328_v33 = vmul.f32 %v1894_v29, %v327_v10  ;;  %1299 = vrsqrt.f32 %v2030_v11  ;;  %v1227_v15 = vadd.f32 -0.85, %v610_v59 }
  0xdb   :  { %v646_v39 = vadd.f32 0.15, %v638_v8  ;;  %v589_v27 = vmul.f32 %v1926_v49, %v520_v40  ;;  %v517_v56 = vpop.xlane.xlu0 %516  ;;  %760 = vperm.xlu2 %1259, %v2016_v42   ;;  %v2053_v40 = vmax.f32 %v1718_v37, 1e-24  ;;  %v384_v16 = vmul.f32 %v2045_v57, %v1973_v50  ;;  %v2092_v34 = vpop.xlane.xlu2 %522 }
  0xdc   :  { %v588_v21 = vmul.f32 %v1877_v4, %v517_v56  ;;  %v660_v54 = vadd.f32 0.15, %v605_v62  ;;  %v2062_v6 = vperm.slane %v1767_v30, 5  ;;  %vm359_vm11 = vweird.f32 %v1885_v32 }
  0xdd   :  { %v654_v43 = vmax.f32 %v646_v39, 0.0  ;;  %v613_v8 = vmul.f32 %v589_v27, %v302_v60  ;;  %v346_v60 = vmul.f32 0.5, %v345_v24  ;;  %v584_v37 = vmul.f32 %v1849_v14, %v1930_v1  ;;  %vm2146_vm2 = vmor %vm359_vm11, %vm360_vm15 }
  0xde   :  { %v2055_v19 = vmul.f32 %v588_v21, %v292_v48  ;;  %v318_v10 = vmul.f32 %v1919_v22, %v317_v38  ;;  %v2078_v56 = vmul.f32 0.5, %v335_v3  ;;  %v364_v24 = vmul.f32 %v2050_v23, %v1980_v55 }
  0xdf   :  { %v631_v58 = vsub.f32 0.0, %v613_v8  ;;  %v694_v39 = vsub.f32 0.0, %v654_v43  ;;  %1301 = vrsqrt.f32 %v2053_v40  ;;  %v357_v1 = vsub.f32 1.5, %v356_v41 }
  0xe0   :  { %v332_v21 = vsel %vm2071_vm8, %v1894_v29, %v328_v33  ;;  %v347_v48 = vsub.f32 1.5, %v346_v60  ;;  %v385_v47 = vmul.f32 %v2045_v57, %v384_v16  ;;  %v2519_v29 = vsel %vm1836_vm1, %v1697_v51, %v1812_v36  ;;  %vm2129_vm1 = vmor %vm349_vm10, %vm350_vm0 }
  0xe1   :  { %v639_v28 = vadd.f32 1.0, %v631_v58  ;;  %v2076_v27 = vmul.f32 %v1227_v15, %v694_v39  ;;  %v676_v15 = vmax.f32 %v660_v54, 0.0  ;;  %v2101_v39 = vpop.eup %1299  ;;  %v608_v41 = vmul.f32 %v584_v37, %v2519_v29  ;;  %vm2221_vm10 = vmor %vm339_vm3, %vm340_vm7 }
  0xe2   :  { %v529_v14 = vpop.xlane.xlu1 %528  ;;  %v322_v60 = vsel %vm2088_vm12, %v1919_v22, %v318_v10  ;;  %v1233_v16 = vadd.f32 -0.15, %v605_v62  ;;  %v1228_v0 = vadd.f32 -0.85, %v613_v8  ;;  %v358_v51 = vmul.f32 %v1970_v17, %v357_v1 }
  0xe3   :  { %v647_v3 = vadd.f32 0.15, %v639_v28  ;;  %v592_v38 = vmul.f32 %v1968_v13, %v529_v14  ;;  %v526_v43 = vpop.xlane.xlu0 %525  ;;  %763 = vperm.xlu0 %1260, %v2076_v27   ;;  %v386_v14 = vmul.f32 0.5, %v385_v47  ;;  %v348_v22 = vmul.f32 %v1985_v25, %v347_v48 }
  0xe4   :  { %v591_v58 = vmul.f32 %v1926_v49, %v526_v43  ;;  %v2123_v62 = vmul.f32 %v1233_v16, %v676_v15  ;;  %v662_v10 = vadd.f32 0.15, %v608_v41  ;;  %v2137_v43 = vmax.f32 %v1758_v63, 1e-24 }
  0xe5   :  { %v655_v33 = vmax.f32 %v647_v3, 0.0  ;;  %v616_v28 = vmul.f32 %v592_v38, %v332_v21  ;;  %v2118_v37 = vpop.eup %1301  ;;  %v414_v3 = vmul.f32 %v2101_v39, %v2030_v11  ;;  %v365_v38 = vmul.f32 %v2050_v23, %v364_v24 }
  0xe6   :  { %v2113_v54 = vmul.f32 %v591_v58, %v322_v60  ;;  %v308_v48 = vmul.f32 %v1840_v46, %v307_v61  ;;  %v337_v24 = vsub.f32 1.5, %v2078_v56  ;;  %v362_v20 = vsel %vm2146_vm2, %v1970_v17, %v358_v51  ;;  %v532_v60 = vpop.xlane.xlu2 %531 }
  0xe7   :  { %v632_v59 = vsub.f32 0.0, %v616_v28  ;;  %v695_v36 = vsub.f32 0.0, %v655_v33  ;;  %v387_v32 = vsub.f32 1.5, %v386_v14  ;;  %v415_v15 = vmul.f32 %v2101_v39, %v414_v3 }
  0xe8   :  { %v352_v58 = vsel %vm2129_vm1, %v1985_v25, %v348_v22  ;;  %v678_v29 = vmax.f32 %v662_v10, 0.0  ;;  %v2524_v17 = vsel %vm1912_vm9, %v1726_v9, %v1891_v53  ;;  %v374_v51 = vmul.f32 %v2118_v37, %v2053_v40  ;;  %vm2181_vm9 = vmor %vm309_vm13, %vm310_vm14 }
  0xe9   :  { %v640_v21 = vadd.f32 1.0, %v632_v59  ;;  %v2133_v1 = vmul.f32 %v1228_v0, %v695_v36  ;;  %v611_v33 = vmul.f32 %v587_v52, %v2524_v17  ;;  %v366_v59 = vmul.f32 0.5, %v365_v38 }
  0xea   :  { %v538_v44 = vpop.xlane.xlu1 %537  ;;  %1303 = vrsqrt.f32 %v2137_v43  ;;  %vm369_vm4 = vweird.f32 %v1980_v55  ;;  %v1235_v36 = vadd.f32 -0.15, %v608_v41  ;;  %v1229_v14 = vadd.f32 -0.85, %v616_v28 }
  0xeb   :  { %v648_v63 = vadd.f32 0.15, %v640_v21  ;;  %v595_v61 = vmul.f32 %v2062_v6, %v538_v44  ;;  %v535_v47 = vpop.xlane.xlu0 %534  ;;  %766 = vperm.xlu2 %1259, %v2133_v1   ;;  %926 = vperm.xlu0 %1260, %v2123_v62   ;;  %v416_v22 = vmul.f32 0.5, %v415_v15  ;;  %v590_v53 = vmul.f32 %v1926_v49, %v2092_v34 }
  0xec   :  { %v594_v56 = vmul.f32 %v1968_v13, %v535_v47  ;;  %v388_v10 = vmul.f32 %v2045_v57, %v387_v32  ;;  %vm390_vm5 = vweird.f32 %v2045_v57  ;;  %v664_v41 = vadd.f32 0.15, %v611_v33 }
  0xed   :  { %v656_v16 = vmax.f32 %v648_v63, 0.0  ;;  %v619_v0 = vmul.f32 %v595_v61, %v362_v20  ;;  %v2189_v52 = vmul.f32 %v1235_v36, %v678_v29  ;;  %v367_v8 = vsub.f32 1.5, %v366_v59  ;;  %vm391_vm11 = vmor %vm389_vm6, %vm390_vm5 }
  0xee   :  { %v2174_v25 = vmul.f32 %v594_v56, %v352_v58  ;;  %v375_v2 = vmul.f32 %v2118_v37, %v374_v51  ;;  %v2196_v38 = vmax.f32 %v1830_v45, 1e-24  ;;  %v312_v49 = vsel %vm2181_vm9, %v1840_v46, %v308_v48  ;;  %v541_v29 = vpop.xlane.xlu2 %540 }
  0xef   :  { %v633_v18 = vsub.f32 0.0, %v619_v0  ;;  %v696_v3 = vsub.f32 0.0, %v656_v16  ;;  %v417_v63 = vsub.f32 1.5, %v416_v22  ;;  %v614_v45 = vmul.f32 %v590_v53, %v312_v49 }
  0xf0   :  { %v2205_v50 = vpop.eup %1303  ;;  %v392_v20 = vsel %vm391_vm11, %v2045_v57, %v388_v10  ;;  %v2209_v61 = vperm.slane %v1767_v30, 7  ;;  %v680_v46 = vmax.f32 %v664_v41, 0.0  ;;  %v338_v48 = vmul.f32 %v1960_v7, %v337_v24 }
  0xf1   :  { %v641_v28 = vadd.f32 1.0, %v633_v18  ;;  %v2191_v21 = vmul.f32 %v1229_v14, %v696_v3  ;;  %v376_v15 = vmul.f32 0.5, %v375_v2  ;;  %1305 = vrsqrt.f32 %v2196_v38 }
  0xf2   :  { %v547_v4 = vpop.xlane.xlu1 %546  ;;  %v368_v58 = vmul.f32 %v2050_v23, %v367_v8  ;;  %vm370_vm8 = vweird.f32 %v2050_v23  ;;  %v1237_v56 = vadd.f32 -0.15, %v611_v33  ;;  %v1230_v17 = vadd.f32 -0.85, %v619_v0 }
  0xf3   :  { %v649_v34 = vadd.f32 0.15, %v641_v28  ;;  %v598_v44 = vmul.f32 %v2151_v12, %v547_v4  ;;  %932 = vperm.xlu0 %1260, %v2189_v52   ;;  %769 = vperm.xlu1 %1258, %v2191_v21   ;;  %v404_v30 = vmul.f32 %v2205_v50, %v2137_v43  ;;  %v666_v59 = vadd.f32 0.15, %v614_v45  ;;  %vm2237_vm14 = vmor %vm369_vm4, %vm370_vm8  ;;  %v544_v3 = vpop.xlane.xlu0 %543 }
  0xf4   :  { %v418_v51 = vmul.f32 %v2101_v39, %v417_v63  ;;  %vm420_vm12 = vweird.f32 %v2101_v39  ;;  %v593_v33 = vmul.f32 %v1968_v13, %v532_v60  ;;  %v2230_v14 = vmul.f32 %v1237_v56, %v680_v46 }
  0xf5   :  { %v657_v47 = vmax.f32 %v649_v34, 0.0  ;;  %v622_v32 = vmul.f32 %v598_v44, %v392_v20  ;;  %vm419_vm13 = vweird.f32 %v2030_v11  ;;  %v596_v18 = vmul.f32 %v2062_v6, %v541_v29 }
  0xf6   :  { %v342_v13 = vsel %vm2221_vm10, %v1960_v7, %v338_v48  ;;  %vm421_vm15 = vmor %vm419_vm13, %vm420_vm12  ;;  %v377_v9 = vsub.f32 1.5, %v376_v15  ;;  %v405_v53 = vmul.f32 %v2205_v50, %v404_v30  ;;  %v682_v10 = vmax.f32 %v666_v59, 0.0 }
  0xf7   :  { %v634_v16 = vsub.f32 0.0, %v622_v32  ;;  %v697_v57 = vsub.f32 0.0, %v657_v47  ;;  %v2248_v55 = vpop.eup %1305  ;;  %v422_v41 = vsel %vm421_vm15, %v2101_v39, %v418_v51  ;;  %v617_v28 = vmul.f32 %v593_v33, %v342_v13 }
  0xf8   :  { %v372_v7 = vsel %vm2237_vm14, %v2050_v23, %v368_v58  ;;  %vm379_vm0 = vweird.f32 %v2053_v40  ;;  %v1239_v4 = vadd.f32 -0.15, %v614_v45  ;;  %vm380_vm1 = vweird.f32 %v2118_v37 }
  0xf9   :  { %v642_v0 = vadd.f32 1.0, %v634_v16  ;;  %v2228_v36 = vmul.f32 %v1230_v17, %v697_v57  ;;  %v620_v49 = vmul.f32 %v596_v18, %v372_v7  ;;  %v1231_v34 = vadd.f32 -0.85, %v622_v32  ;;  %vm381_vm2 = vmor %vm379_vm0, %vm380_vm1 }
  0xfa   :  { %v556_v22 = vpop.xlane.xlu1 %555  ;;  %v406_v20 = vmul.f32 0.5, %v405_v53  ;;  %v434_v39 = vmul.f32 %v2248_v55, %v2196_v38  ;;  %v378_v46 = vmul.f32 %v2118_v37, %v377_v9  ;;  %v2260_v48 = vmul.f32 %v1239_v4, %v682_v10 }
  0xfb   :  { %v650_v60 = vadd.f32 0.15, %v642_v0  ;;  %v601_v11 = vmul.f32 %v2209_v61, %v556_v22  ;;  %772 = vperm.xlu2 %1259, %v2228_v36   ;;  %938 = vperm.xlu0 %1260, %v2230_v14   ;;  %v668_v23 = vadd.f32 0.15, %v617_v28  ;;  %v597_v47 = vmul.f32 %v2062_v6, %v544_v3  ;;  %v553_v17 = vpop.xlane.xlu0 %552 }
  0xfc   :  { %v670_v15 = vadd.f32 0.15, %v620_v49  ;;  %v407_v32 = vsub.f32 1.5, %v406_v20  ;;  %v435_v56 = vmul.f32 %v2248_v55, %v434_v39  ;;  %v382_v29 = vsel %vm381_vm2, %v2118_v37, %v378_v46 }
  0xfd   :  { %v658_v8 = vmax.f32 %v650_v60, 0.0  ;;  %v625_v2 = vmul.f32 %v601_v11, %v422_v41  ;;  %v684_v16 = vmax.f32 %v668_v23, 0.0  ;;  %v621_v57 = vmul.f32 %v597_v47, %v382_v29  ;;  %v2531_v60 = vld [vmem:[#allocation11_spill] sm:$0xff] }
  0xfe   :  { %vm409_vm3 = vweird.f32 %v2137_v43  ;;  %v686_v6 = vmax.f32 %v670_v15, 0.0  ;;  %vm410_vm4 = vweird.f32 %v2205_v50  ;;  %v1241_v59 = vadd.f32 -0.15, %v617_v28 }
  0xff   :  { %v635_v44 = vsub.f32 0.0, %v625_v2  ;;  %v698_v63 = vsub.f32 0.0, %v658_v8  ;;  %v1232_v24 = vadd.f32 -0.85, %v625_v2  ;;  %v436_v33 = vmul.f32 0.5, %v435_v56  ;;  %vm411_vm9 = vmor %vm409_vm3, %vm410_vm4 }
 0x100   :  { %v661_v0 = vadd.f32 0.15, %v1923_v31  ;;  %v1243_v26 = vadd.f32 -0.15, %v620_v49  ;;  %v408_v18 = vmul.f32 %v2205_v50, %v407_v32  ;;  %v671_v3 = vadd.f32 0.15, %v621_v57 }
 0x101   :  { %v643_v40 = vadd.f32 1.0, %v635_v44  ;;  %v2263_v45 = vmul.f32 %v1231_v34, %v698_v63  ;;  %v600_v37 = vmul.f32 %v2151_v12, %v553_v17  ;;  %v2276_v13 = vmul.f32 %v1241_v59, %v684_v16 }
 0x102   :  { %v2278_v43 = vmul.f32 %v1243_v26, %v686_v6  ;;  %v2281_v11 = vmax.f32 %v2531_v60, 1e-24  ;;  %v437_v9 = vsub.f32 1.5, %v436_v33  ;;  %v677_v53 = vmax.f32 %v661_v0, 0.0 }
 0x103   :  { %v651_v58 = vadd.f32 0.15, %v643_v40  ;;  %944 = vperm.xlu0 %1260, %v2260_v48   ;;  %775 = vperm.xlu1 %1258, %v2263_v45   ;;  %v412_v10 = vsel %vm411_vm9, %v2205_v50, %v408_v18  ;;  %v687_v41 = vmax.f32 %v671_v3, 0.0  ;;  %vm439_vm5 = vweird.f32 %v2196_v38  ;;  %v562_v8 = vpop.xlane.xlu0 %561  ;;  %v2532_v38 = vld [vmem:[#allocation12_spill] sm:$0xff]  ;;  %v550_v3 = vpop.xlane.xlu2 %549 }
 0x104   :  { %v624_v28 = vmul.f32 %v600_v37, %v412_v10  ;;  %v1234_v7 = vadd.f32 -0.15, %v1923_v31  ;;  %vm440_vm6 = vweird.f32 %v2248_v55  ;;  %1307 = vrsqrt.f32 %v2281_v11 }
 0x105   :  { %v659_v30 = vmax.f32 %v651_v58, 0.0  ;;  %v1244_v2 = vadd.f32 -0.15, %v621_v57  ;;  %v438_v4 = vmul.f32 %v2248_v55, %v437_v9  ;;  %v663_v50 = vadd.f32 0.15, %v1992_v35  ;;  %vm441_vm7 = vmor %vm439_vm5, %vm440_vm6 }
 0x106   :  { %v2292_v49 = vmul.f32 %v1234_v7, %v677_v53  ;;  %v673_v34 = vadd.f32 0.15, %v624_v28  ;;  %v603_v44 = vmul.f32 %v2209_v61, %v562_v8  ;;  %v201_v31 = vmax.f32 %v2532_v38, 1e-24 }
 0x107   :  { %v699_v51 = vsub.f32 0.0, %v659_v30  ;;  %v2296_v63 = vmul.f32 %v1244_v2, %v687_v41  ;;  %v442_v20 = vsel %vm441_vm7, %v2248_v55, %v438_v4  ;;  %v679_v46 = vmax.f32 %v663_v50, 0.0 }
 0x108   :  { %v689_v23 = vmax.f32 %v673_v34, 0.0  ;;  %v627_v47 = vmul.f32 %v603_v44, %v442_v20  ;;  %1309 = vrsqrt.f32 %v201_v31  ;;  %v1236_v40 = vadd.f32 -0.15, %v1992_v35 }
 0x109   :  { %v2274_v22 = vmul.f32 %v1232_v24, %v699_v51  ;;  %v1246_v15 = vadd.f32 -0.15, %v624_v28  ;;  %v665_v32 = vadd.f32 0.15, %v2055_v19  ;;  %v1238_v35 = vadd.f32 -0.15, %v2055_v19 }
 0x10a   :  { %v1308_v39 = vpop.eup %1307  ;;  %v675_v56 = vadd.f32 0.15, %v627_v47  ;;  %v2305_v29 = vmul.f32 %v1236_v40, %v679_v46  ;;  %v1248_v6 = vadd.f32 -0.15, %v627_v47  ;;  %v667_v51 = vadd.f32 0.15, %v2113_v54 }
 0x10b   :  { %778 = vperm.xlu2 %1259, %v2274_v22   ;;  %950 = vperm.xlu0 %1260, %v2276_v13   ;;  %v394_v58 = vmul.f32 %v1308_v39, %v2281_v11  ;;  %v2307_v17 = vmul.f32 %v1246_v15, %v689_v23  ;;  %v681_v57 = vmax.f32 %v665_v32, 0.0  ;;  %vm399_vm11 = vweird.f32 %v2281_v11  ;;  %v559_v11 = vpop.xlane.xlu2 %558 }
 0x10c   :  { %956 = vperm.xlu1 %1258, %v2278_v43   ;;  %v691_v30 = vmax.f32 %v675_v56, 0.0  ;;  %v683_v37 = vmax.f32 %v667_v51, 0.0  ;;  %vm400_vm8 = vweird.f32 %v1308_v39  ;;  %v1240_v19 = vadd.f32 -0.15, %v2113_v54 }
 0x10d   :  { %v395_v55 = vmul.f32 %v1308_v39, %v394_v58  ;;  %v2313_v33 = vmul.f32 %v1238_v35, %v681_v57  ;;  %v669_v53 = vadd.f32 0.15, %v2174_v25  ;;  %vm401_vm10 = vmor %vm399_vm11, %vm400_vm8  ;;  %v599_v10 = vmul.f32 %v2151_v12, %v550_v3 }
 0x10e   :  { %v1310_v16 = vpop.eup %1309  ;;  %v2315_v0 = vmul.f32 %v1248_v6, %v691_v30  ;;  %v2323_v41 = vmul.f32 %v1240_v19, %v683_v37  ;;  %vm429_vm12 = vweird.f32 %v201_v31  ;;  %v1242_v54 = vadd.f32 -0.15, %v2174_v25 }
 0x10f   :  { %v396_v59 = vmul.f32 0.5, %v395_v55  ;;  %v424_v24 = vmul.f32 %v1310_v16, %v201_v31  ;;  %v685_v8 = vmax.f32 %v669_v53, 0.0  ;;  %vm430_vm13 = vweird.f32 %v1310_v16 }
 0x110   :  { %vm431_vm14 = vmor %vm429_vm12, %vm430_vm13  ;;  %v602_v34 = vmul.f32 %v2209_v61, %v559_v11  ;;  %v780_v56 = vlaneseq  ;;  %vm790_vm15 = vcmask 1041409   ;;  %vm792_vm0 = vcmask 1042434  }
 0x111   :  { %v397_v26 = vsub.f32 1.5, %v396_v59  ;;  %v425_v18 = vmul.f32 %v1310_v16, %v424_v24  ;;  %v2328_v44 = vmul.f32 %v1242_v54, %v685_v8  ;;  %vm794_vm1 = vcmask 1043459  }
 0x112   :  { %v2337_v30 = vand.u32 127, %v780_v56  ;;  %vm796_vm2 = vcmask 1044484   ;;  %vm798_vm3 = vcmask 1045509   ;;  %vm800_vm4 = vcmask 1046534  }
 0x113   :  { %929 = vperm.xlu2 %1259, %v2292_v49   ;;  %959 = vperm.xlu0 %1260, %v2296_v63   ;;  %v426_v60 = vmul.f32 0.5, %v425_v18  ;;  %v398_v9 = vmul.f32 %v1308_v39, %v397_v26  ;;  %vm802_vm9 = vcmask 1047559   ;;  %vm805_vm5 = vcmask 64512  }
 0x114   :  { %vm976_vm6 = vcmask 130112   ;;  %vm1007_vm7 = vcmask 130048   ;;  %vm1184_vm11 = vcmask 7168   ;;  %vm1201_vm8 = vcmask 0  }
 0x115   :  { %v427_v28 = vsub.f32 1.5, %v426_v60  ;;  %v402_v7 = vsel %vm401_vm10, %v1308_v39, %v398_v9 }
 0x116   :  { %v623_v2 = vmul.f32 %v599_v10, %v402_v7 }
 0x117   :  { %v428_v4 = vmul.f32 %v1310_v16, %v427_v28 }
 0x118   :  { %v672_v50 = vadd.f32 0.15, %v623_v2  ;;  %v1245_v39 = vadd.f32 -0.15, %v623_v2 }
 0x119   :  { %v432_v12 = vsel %vm431_vm14, %v1310_v16, %v428_v4 }
 0x11a   :  { %v688_v38 = vmax.f32 %v672_v50, 0.0  ;;  %v626_v20 = vmul.f32 %v602_v34, %v432_v12 }
 0x11b   :  { %935 = vperm.xlu2 %1259, %v2305_v29   ;;  %965 = vperm.xlu0 %1260, %v2307_v17  }
 0x11c   :  { %v674_v46 = vadd.f32 0.15, %v626_v20  ;;  %v2331_v23 = vmul.f32 %v1245_v39, %v688_v38  ;;  %v1247_v25 = vadd.f32 -0.15, %v626_v20 }
 0x11e   :  { %v690_v31 = vmax.f32 %v674_v46, 0.0  ;;  %v2356_v46 = vadd.s32 4294967288, %v2337_v30 }
 0x120   :  { %v2334_v47 = vmul.f32 %v1247_v25, %v690_v31 }
 0x123   :  { %941 = vperm.xlu2 %1259, %v2313_v33   ;;  %971 = vperm.xlu0 %1260, %v2315_v0  }
 0x12b   :  { %947 = vperm.xlu2 %1259, %v2323_v41  }
 0x133   :  { %953 = vperm.xlu2 %1259, %v2328_v44  }
 0x135   :  { %v761_v61 = vpop.permute.xlu2 %760 }
 0x136   :  { %v783_v59 = vperm.slane %v761_v61, %v2337_v30 }
 0x13b   :  { %962 = vperm.xlu2 %1259, %v2331_v23  }
 0x143   :  { %968 = vperm.xlu2 %1259, %v2334_v47  }
 0x145   :  { %v767_v40 = vpop.permute.xlu2 %766  ;;  %v758_v55 = vpop.permute.xlu1 %757 }
 0x146   :  { %v782_v35 = vperm.slane %v758_v55, %v2337_v30  ;;  %v785_v19 = vperm.slane %v767_v40, %v2337_v30 }
 0x148   :  { %v791_v18 = vsel %vm790_vm15, %v783_v59, %v782_v35 }
 0x155   :  { %v764_v15 = vpop.permute.xlu0 %763  ;;  %v773_v58 = vpop.permute.xlu2 %772 }
 0x156   :  { %v784_v6 = vperm.slane %v764_v15, %v2337_v30  ;;  %v787_v53 = vperm.slane %v773_v58, %v2337_v30 }
 0x158   :  { %v793_v3 = vsel %vm792_vm0, %v784_v6, %v791_v18 }
 0x159   :  { %v795_v60 = vsel %vm794_vm1, %v785_v19, %v793_v3 }
 0x15d   :  { %v927_v32 = vpop.permute.xlu0 %926 }
 0x15e   :  { %v973_v35 = vperm.slane %v927_v32, %v2337_v30 }
 0x165   :  { %v779_v16 = vpop.permute.xlu2 %778  ;;  %v933_v57 = vpop.permute.xlu0 %932 }
 0x166   :  { %v770_v24 = vpop.permute.xlu1 %769  ;;  %v789_v2 = vperm.slane %v779_v16, %v2337_v30  ;;  %v978_v40 = vperm.slane %v933_v57, %v2337_v30 }
 0x167   :  { %v786_v37 = vperm.slane %v770_v24, %v2337_v30 }
 0x169   :  { %v797_v9 = vsel %vm796_vm2, %v786_v37, %v795_v60 }
 0x16a   :  { %v799_v11 = vsel %vm798_vm3, %v787_v53, %v797_v9 }
 0x16d   :  { %v930_v51 = vpop.permute.xlu2 %929  ;;  %v939_v26 = vpop.permute.xlu0 %938 }
 0x16e   :  { %v975_v15 = vperm.slane %v930_v51, %v2356_v46  ;;  %v981_v56 = vperm.slane %v939_v26, %v2337_v30 }
 0x170   :  { %v977_v51 = vsel %vm976_vm6, %v975_v15, %v973_v35 }
 0x175   :  { %v776_v10 = vpop.permute.xlu1 %775  ;;  %v936_v28 = vpop.permute.xlu2 %935 }
 0x176   :  { %v788_v7 = vperm.slane %v776_v10, %v2337_v30  ;;  %v945_v8 = vpop.permute.xlu0 %944  ;;  %v979_v25 = vperm.slane %v936_v28, %v2356_v46 }
 0x177   :  { %v984_v59 = vperm.slane %v945_v8, %v2337_v30 }
 0x178   :  { %v801_v54 = vsel %vm800_vm4, %v788_v7, %v799_v11  ;;  %v980_v6 = vsel %vm976_vm6, %v979_v25, %v978_v40 }
 0x179   :  { %v803_v4 = vsel %vm802_vm9, %v789_v2, %v801_v54  ;;  %v999_v3 = vsel %vm790_vm15, %v980_v6, %v977_v51 }
 0x17a   :  { %v806_v50 = vsel %vm805_vm5, %v803_v4, -inf }
 0x17b   :  { %807 = vmax.xlane.f32.xlu1 %v806_v50 }
 0x17d   :  { %v942_v34 = vpop.permute.xlu2 %941 }
 0x17e   :  { %v951_v12 = vpop.permute.xlu0 %950  ;;  %v982_v61 = vperm.slane %v942_v34, %v2356_v46  ;;  %v957_v26 = vpop.permute.xlu1 %956 }
 0x17f   :  { %v987_v57 = vperm.slane %v951_v12, %v2337_v30  ;;  %v990_v28 = vperm.slane %v957_v26, %v2337_v30 }
 0x180   :  { %v983_v24 = vsel %vm976_vm6, %v982_v61, %v981_v56 }
 0x181   :  { %v1000_v32 = vsel %vm792_vm0, %v983_v24, %v999_v3 }
 0x185   :  { %v948_v38 = vpop.permute.xlu2 %947 }
 0x186   :  { %v960_v20 = vpop.permute.xlu0 %959  ;;  %v985_v58 = vperm.slane %v948_v38, %v2356_v46 }
 0x187   :  { %v991_v60 = vperm.slane %v960_v20, %v2356_v46 }
 0x188   :  { %v986_v18 = vsel %vm976_vm6, %v985_v58, %v984_v59 }
 0x189   :  { %v1001_v9 = vsel %vm794_vm1, %v986_v18, %v1000_v32  ;;  %v992_v11 = vsel %vm976_vm6, %v991_v60, %v990_v28 }
 0x18d   :  { %v954_v39 = vpop.permute.xlu2 %953 }
 0x18e   :  { %v966_v31 = vpop.permute.xlu0 %965  ;;  %v988_v55 = vperm.slane %v954_v39, %v2356_v46 }
 0x18f   :  { %v994_v53 = vperm.slane %v966_v31, %v2356_v46 }
 0x190   :  { %v989_v37 = vsel %vm976_vm6, %v988_v55, %v987_v57 }
 0x191   :  { %v1002_v7 = vsel %vm796_vm2, %v989_v37, %v1001_v9 }
 0x192   :  { %v1003_v50 = vsel %vm798_vm3, %v992_v11, %v1002_v7 }
 0x195   :  { %v963_v16 = vpop.permute.xlu2 %962 }
 0x196   :  { %v993_v19 = vperm.slane %v963_v16, %v2337_v30  ;;  %v972_v10 = vpop.permute.xlu0 %971 }
 0x197   :  { %v997_v54 = vperm.slane %v972_v10, %v2356_v46 }
 0x198   :  { %v995_v8 = vsel %vm976_vm6, %v994_v53, %v993_v19 }
 0x199   :  { %v1004_v12 = vsel %vm800_vm4, %v995_v8, %v1003_v50 }
 0x19d   :  { %v969_v2 = vpop.permute.xlu2 %968 }
 0x19e   :  { %v996_v4 = vperm.slane %v969_v2, %v2337_v30 }
 0x1a0   :  { %v998_v34 = vsel %vm976_vm6, %v997_v54, %v996_v4 }
 0x1a1   :  { %v1005_v38 = vsel %vm802_vm9, %v998_v34, %v1004_v12 }
 0x1a2   :  { %v1008_v20 = vsel %vm1007_vm7, %v1005_v38, -inf }
 0x1a3   :  { %1009 = vmax.xlane.f32.xlu2 %v1008_v20 }
 0x1ee   :  { %v808_v39 = vpop.xlane.xlu1 %807 }
 0x1ef   :  { %v2390_v25 = vmax.f32 %v808_v39, 0.0 }
 0x1f1   :  { %v819_v16 = vperm.slane %v2390_v25, 5  ;;  %v821_v9 = vperm.slane %v2390_v25, 7 }
 0x1f3   :  { %v835_v57 = vsub.f32 %v2228_v36, %v819_v16 }
 0x1f5   :  { %v848_v18 = vmul.f32 1.442695, %v835_v57 }
 0x216   :  { %v1010_v31 = vpop.xlane.xlu2 %1009 }
 0x217   :  { %v2392_v61 = vmax.f32 %v1010_v31, 0.0 }
 0x219   :  { %v1019_v40 = vperm.slane %v2392_v61, 3  ;;  %v1016_v15 = vperm.slane %v2392_v61, 0  ;;  %v1017_v35 = vperm.slane %v2392_v61, 1  ;;  %v1018_v3 = vperm.slane %v2392_v61, 2 }
 0x21a   :  { %v1020_v7 = vperm.slane %v2392_v61, 4  ;;  %v1021_v34 = vperm.slane %v2392_v61, 5  ;;  %v1022_v31 = vperm.slane %v2392_v61, 6 }
 0x21b   :  { %v1039_v58 = vsub.f32 %v2323_v41, %v1019_v40  ;;  %v1033_v56 = vsub.f32 %v2292_v49, %v1016_v15  ;;  %v1032_v55 = vsub.f32 %v2123_v62, %v1016_v15  ;;  %v1035_v51 = vsub.f32 %v2305_v29, %v1017_v35 }
 0x21c   :  { %v1034_v41 = vsub.f32 %v2189_v52, %v1017_v35  ;;  %v820_v49 = vperm.slane %v2390_v25, 6  ;;  %v1037_v29 = vsub.f32 %v2313_v33, %v1018_v3  ;;  %v1036_v52 = vsub.f32 %v2230_v14, %v1018_v3 }
 0x21d   :  { %v1062_v6 = vmul.f32 1.442695, %v1039_v58  ;;  %v1050_v59 = vmul.f32 1.442695, %v1033_v56  ;;  %v1048_v24 = vmul.f32 1.442695, %v1032_v55  ;;  %v1038_v33 = vsub.f32 %v2260_v48, %v1019_v40 }
 0x21e   :  { %v1054_v62 = vmul.f32 1.442695, %v1035_v51  ;;  %v1052_v37 = vmul.f32 1.442695, %v1034_v41  ;;  %v836_v36 = vsub.f32 %v2263_v45, %v820_v49  ;;  %v1058_v53 = vmul.f32 1.442695, %v1037_v29 }
 0x21f   :  { %1311 = vpow2.f32 %v1062_v6  ;;  %v1056_v28 = vmul.f32 1.442695, %v1036_v52  ;;  %v837_v45 = vsub.f32 %v2274_v22, %v821_v9  ;;  %v1041_v14 = vsub.f32 %v2328_v44, %v1020_v7 }
 0x220   :  { %1313 = vpow2.f32 %v1050_v59  ;;  %v850_v60 = vmul.f32 1.442695, %v836_v36  ;;  %v1060_v54 = vmul.f32 1.442695, %v1038_v33  ;;  %v1040_v22 = vsub.f32 %v2276_v13, %v1020_v7 }
 0x221   :  { %1315 = vpow2.f32 %v1048_v24  ;;  %v852_v11 = vmul.f32 1.442695, %v837_v45  ;;  %v1066_v50 = vmul.f32 1.442695, %v1041_v14  ;;  %v1042_v48 = vsub.f32 %v2278_v43, %v1021_v34 }
 0x222   :  { %1317 = vpow2.f32 %v848_v18  ;;  %v1064_v20 = vmul.f32 1.442695, %v1040_v22  ;;  %v1043_v58 = vsub.f32 %v2296_v63, %v1021_v34  ;;  %v1044_v56 = vsub.f32 %v2331_v23, %v1022_v31 }
 0x223   :  { %1319 = vpow2.f32 %v1054_v62  ;;  %v1068_v39 = vmul.f32 1.442695, %v1042_v48  ;;  %v814_v43 = vperm.slane %v2390_v25, 0  ;;  %v1045_v6 = vsub.f32 %v2307_v17, %v1022_v31 }
 0x224   :  { %1321 = vpow2.f32 %v1052_v37  ;;  %v1070_v13 = vmul.f32 1.442695, %v1043_v58  ;;  %v1072_v55 = vmul.f32 1.442695, %v1044_v56  ;;  %v815_v63 = vperm.slane %v2390_v25, 1 }
 0x225   :  { %v1312_v26 = vpop.eup %1311  ;;  %1323 = vpow2.f32 %v850_v60  ;;  %v830_v59 = vsub.f32 %v1983_v5, %v814_v43  ;;  %v1074_v24 = vmul.f32 1.442695, %v1045_v6  ;;  %v816_v23 = vperm.slane %v2390_v25, 2 }
 0x226   :  { %v1314_v19 = vpop.eup %1313  ;;  %1118 = vperm.xlu2 %1259, %v1312_v26   ;;  %1325 = vpow2.f32 %v1058_v53  ;;  %v831_v18 = vsub.f32 %v2016_v42, %v815_v63  ;;  %v818_v62 = vperm.slane %v2390_v25, 4  ;;  %v817_v3 = vperm.slane %v2390_v25, 3 }
 0x227   :  { %v1316_v32 = vpop.eup %1315  ;;  %1100 = vperm.xlu0 %1260, %v1314_v19   ;;  %1327 = vpow2.f32 %v1056_v28  ;;  %v838_v57 = vmul.f32 1.442695, %v830_v59  ;;  %v832_v49 = vsub.f32 %v2076_v27, %v816_v23  ;;  %v1023_v36 = vperm.slane %v2392_v61, 7 }
 0x228   :  { %1097 = vperm.xlu1 %1258, %v1316_v32   ;;  %v1318_v10 = vpop.eup %1317  ;;  %1329 = vpow2.f32 %v852_v11  ;;  %v840_v17 = vmul.f32 1.442695, %v831_v18  ;;  %v834_v19 = vsub.f32 %v2191_v21, %v818_v62  ;;  %v833_v32 = vsub.f32 %v2133_v1, %v817_v3 }
 0x229   :  { %v1320_v8 = vpop.eup %1319  ;;  %1331 = vpow2.f32 %v1060_v54  ;;  %v842_v5 = vmul.f32 1.442695, %v832_v49  ;;  %v1047_v60 = vsub.f32 %v2315_v0, %v1023_v36  ;;  %v1046_v9 = vsub.f32 %v2334_v47, %v1023_v36 }
 0x22a   :  { %v1322_v2 = vpop.eup %1321  ;;  %1333 = vpow2.f32 %v1066_v50  ;;  %v846_v42 = vmul.f32 1.442695, %v834_v19  ;;  %v844_v27 = vmul.f32 1.442695, %v833_v32 }
 0x22b   :  { %v1324_v4 = vpop.eup %1323  ;;  %1335 = vpow2.f32 %v1064_v20  ;;  %v1078_v53 = vmul.f32 1.442695, %v1047_v60 }
 0x22c   :  { %v1326_v12 = vpop.eup %1325  ;;  %1337 = vpow2.f32 %v1068_v39 }
 0x22d   :  { %v1328_v38 = vpop.eup %1327  ;;  %1339 = vpow2.f32 %v1070_v13 }
 0x22e   :  { %878 = vperm.xlu2 %1259, %v1318_v10   ;;  %v1330_v44 = vpop.eup %1329  ;;  %1341 = vpow2.f32 %v1072_v55  ;;  %v1076_v10 = vmul.f32 1.442695, %v1046_v9 }
 0x22f   :  { %1106 = vperm.xlu0 %1260, %v1320_v8   ;;  %v1332_v40 = vpop.eup %1331  ;;  %1343 = vpow2.f32 %v1074_v24 }
 0x230   :  { %1103 = vperm.xlu1 %1258, %v1322_v2   ;;  %v1334_v15 = vpop.eup %1333  ;;  %1345 = vpow2.f32 %v838_v57 }
 0x231   :  { %v1336_v16 = vpop.eup %1335  ;;  %1347 = vpow2.f32 %v840_v17 }
 0x232   :  { %v1338_v35 = vpop.eup %1337  ;;  %1349 = vpow2.f32 %v842_v5 }
 0x233   :  { %v1340_v51 = vpop.eup %1339  ;;  %1351 = vpow2.f32 %v846_v42 }
 0x234   :  { %v1342_v41 = vpop.eup %1341  ;;  %1353 = vpow2.f32 %v844_v27 }
 0x235   :  { %v1344_v26 = vpop.eup %1343  ;;  %1355 = vpow2.f32 %v1078_v53 }
 0x236   :  { %881 = vperm.xlu2 %1259, %v1324_v4   ;;  %v1346_v37 = vpop.eup %1345  ;;  %1357 = vpow2.f32 %v1076_v10 }
 0x237   :  { %1112 = vperm.xlu0 %1260, %v1326_v12   ;;  %v1348_v29 = vpop.eup %1347 }
 0x238   :  { %1109 = vperm.xlu1 %1258, %v1328_v38   ;;  %v1350_v52 = vpop.eup %1349 }
 0x239   :  { %v1352_v21 = vpop.eup %1351 }
 0x23a   :  { %v1354_v28 = vpop.eup %1353 }
 0x23b   :  { %v1356_v1 = vpop.eup %1355 }
 0x23c   :  { %v1358_v7 = vpop.eup %1357 }
 0x23e   :  { %884 = vperm.xlu2 %1259, %v1330_v44  }
 0x23f   :  { %1115 = vperm.xlu0 %1260, %v1332_v40  }
 0x240   :  { %1124 = vperm.xlu1 %1258, %v1334_v15  }
 0x247   :  { %1121 = vperm.xlu0 %1260, %v1336_v16  }
 0x248   :  { %1127 = vperm.xlu1 %1258, %v1338_v35  }
 0x24f   :  { %1130 = vperm.xlu0 %1260, %v1340_v51  }
 0x250   :  { %1133 = vperm.xlu1 %1258, %v1342_v41  }
 0x257   :  { %1136 = vperm.xlu0 %1260, %v1344_v26  }
 0x258   :  { %863 = vperm.xlu1 %1258, %v1346_v37  }
 0x25f   :  { %866 = vperm.xlu0 %1260, %v1348_v29  }
 0x260   :  { %869 = vperm.xlu1 %1258, %v1350_v52  }
 0x267   :  { %875 = vperm.xlu0 %1260, %v1352_v21  }
 0x268   :  { %872 = vperm.xlu1 %1258, %v1354_v28  }
 0x26f   :  { %1142 = vperm.xlu0 %1260, %v1356_v1  }
 0x270   :  { %1139 = vperm.xlu1 %1258, %v1358_v7  }
 0x280   :  { %v1119_v38 = vpop.permute.xlu2 %1118 }
 0x281   :  { %v1154_v51 = vperm.slane %v1119_v38, %v2356_v46  ;;  %v1012_v38 = vsub.f32 0.0, %v2392_v61 }
 0x288   :  { %v879_v20 = vpop.permute.xlu2 %878 }
 0x289   :  { %v891_v41 = vperm.slane %v879_v20, %v2337_v30 }
 0x290   :  { %v882_v40 = vpop.permute.xlu2 %881 }
 0x291   :  { %v892_v62 = vperm.slane %v882_v40, %v2337_v30 }
 0x298   :  { %v885_v18 = vpop.permute.xlu2 %884 }
 0x299   :  { %v1101_v8 = vpop.permute.xlu0 %1100  ;;  %v893_v36 = vperm.slane %v885_v18, %v2337_v30 }
 0x29a   :  { %v1145_v2 = vperm.slane %v1101_v8, %v2356_v46  ;;  %v1098_v45 = vpop.permute.xlu1 %1097 }
 0x29b   :  { %v1144_v0 = vperm.slane %v1098_v45, %v2337_v30 }
 0x29d   :  { %v1146_v47 = vsel %vm976_vm6, %v1145_v2, %v1144_v0 }
 0x2a1   :  { %v1107_v33 = vpop.permute.xlu0 %1106 }
 0x2a2   :  { %v1104_v14 = vpop.permute.xlu1 %1103  ;;  %v1148_v55 = vperm.slane %v1107_v33, %v2356_v46 }
 0x2a3   :  { %v1147_v43 = vperm.slane %v1104_v14, %v2337_v30 }
 0x2a5   :  { %v1149_v5 = vsel %vm976_vm6, %v1148_v55, %v1147_v43 }
 0x2a6   :  { %v1168_v60 = vsel %vm790_vm15, %v1149_v5, %v1146_v47 }
 0x2a9   :  { %v1113_v11 = vpop.permute.xlu0 %1112 }
 0x2aa   :  { %v1110_v54 = vpop.permute.xlu1 %1109  ;;  %v1151_v6 = vperm.slane %v1113_v11, %v2356_v46 }
 0x2ab   :  { %v1150_v59 = vperm.slane %v1110_v54, %v2337_v30 }
 0x2ad   :  { %v1152_v37 = vsel %vm976_vm6, %v1151_v6, %v1150_v59 }
 0x2ae   :  { %v1169_v21 = vsel %vm792_vm0, %v1152_v37, %v1168_v60 }
 0x2b1   :  { %v1116_v4 = vpop.permute.xlu0 %1115 }
 0x2b2   :  { %v1125_v50 = vpop.permute.xlu1 %1124  ;;  %v1153_v57 = vperm.slane %v1116_v4, %v2337_v30 }
 0x2b3   :  { %v1157_v19 = vperm.slane %v1125_v50, %v2356_v46 }
 0x2b4   :  { %v1155_v27 = vsel %vm976_vm6, %v1154_v51, %v1153_v57  ;;  %v1450_v51 = vmov 0.0  }
 0x2b5   :  { %v1170_v8 = vsel %vm794_vm1, %v1155_v27, %v1169_v21  ;;  %1202 = vst.msk [vmem:[#allocation7] sm:$0x1] %vm1201_vm8, %v1450_v51 }
 0x2b9   :  { %v1122_v34 = vpop.permute.xlu0 %1121 }
 0x2ba   :  { %v1128_v12 = vpop.permute.xlu1 %1127  ;;  %v1156_v49 = vperm.slane %v1122_v34, %v2337_v30 }
 0x2bb   :  { %v1159_v29 = vperm.slane %v1128_v12, %v2337_v30 }
 0x2bc   :  { %v1158_v9 = vsel %vm976_vm6, %v1157_v19, %v1156_v49 }
 0x2bd   :  { %v1171_v33 = vsel %vm796_vm2, %v1158_v9, %v1170_v8 }
 0x2c1   :  { %v1131_v22 = vpop.permute.xlu0 %1130 }
 0x2c2   :  { %v1134_v48 = vpop.permute.xlu1 %1133  ;;  %v1160_v3 = vperm.slane %v1131_v22, %v2356_v46  ;;  %v1013_v22 = vmul.f32 1.442695, %v1012_v38 }
 0x2c3   :  { %v1162_v53 = vperm.slane %v1134_v48, %v2337_v30 }
 0x2c4   :  { %v1161_v28 = vsel %vm976_vm6, %v1160_v3, %v1159_v29 }
 0x2c5   :  { %v1172_v11 = vsel %vm798_vm3, %v1161_v28, %v1171_v33 }
 0x2c9   :  { %v1137_v44 = vpop.permute.xlu0 %1136 }
 0x2ca   :  { %v864_v39 = vpop.permute.xlu1 %863  ;;  %v1163_v32 = vperm.slane %v1137_v44, %v2356_v46 }
 0x2cb   :  { %v886_v56 = vperm.slane %v864_v39, %v2337_v30 }
 0x2cc   :  { %v1164_v2 = vsel %vm976_vm6, %v1163_v32, %v1162_v53 }
 0x2cd   :  { %v1173_v4 = vsel %vm800_vm4, %v1164_v2, %v1172_v11 }
 0x2d1   :  { %v867_v31 = vpop.permute.xlu0 %866 }
 0x2d2   :  { %v870_v15 = vpop.permute.xlu1 %869  ;;  %v887_v58 = vperm.slane %v867_v31, %v2337_v30 }
 0x2d3   :  { %v888_v13 = vperm.slane %v870_v15, %v2337_v30 }
 0x2d4   :  { %v894_v16 = vsel %vm790_vm15, %v887_v58, %v886_v56 }
 0x2d5   :  { %v895_v17 = vsel %vm792_vm0, %v888_v13, %v894_v16 }
 0x2d9   :  { %v876_v35 = vpop.permute.xlu0 %875 }
 0x2da   :  { %v890_v24 = vperm.slane %v876_v35, %v2337_v30  ;;  %v873_v63 = vpop.permute.xlu1 %872 }
 0x2db   :  { %v889_v23 = vperm.slane %v873_v63, %v2337_v30 }
 0x2dd   :  { %v896_v26 = vsel %vm794_vm1, %v889_v23, %v895_v17 }
 0x2de   :  { %v897_v42 = vsel %vm796_vm2, %v890_v24, %v896_v26 }
 0x2df   :  { %v898_v52 = vsel %vm798_vm3, %v891_v41, %v897_v42 }
 0x2e0   :  { %v899_v10 = vsel %vm800_vm4, %v892_v62, %v898_v52 }
 0x2e1   :  { %v1143_v1 = vpop.permute.xlu0 %1142  ;;  %v900_v7 = vsel %vm802_vm9, %v893_v36, %v899_v10 }
 0x2e2   :  { %v1166_v45 = vperm.slane %v1143_v1, %v2356_v46  ;;  %v1140_v0 = vpop.permute.xlu1 %1139  ;;  %v902_v47 = vsel %vm805_vm5, %v900_v7, 0.0  ;;  %v810_v46 = vsub.f32 0.0, %v2390_v25 }
 0x2e3   :  { %v1165_v14 = vperm.slane %v1140_v0, %v2337_v30  ;;  %903 = vadd.xlane.f32.xlu1 %v902_v47 }
 0x2e4   :  { %v811_v12 = vmul.f32 1.442695, %v810_v46 }
 0x2e5   :  { %v1167_v54 = vsel %vm976_vm6, %v1166_v45, %v1165_v14 }
 0x2e6   :  { %v1174_v50 = vsel %vm802_vm9, %v1167_v54, %v1173_v4  ;;  %1359 = vpow2.f32 %v811_v12 }
 0x2e7   :  { %v1176_v34 = vsel %vm1007_vm7, %v1174_v50, 0.0  ;;  %1361 = vpow2.f32 %v1013_v22 }
 0x2e8   :  { %1177 = vadd.xlane.f32.xlu0 %v1176_v34 }
 0x2ec   :  { %v1360_v30 = vpop.eup %1359 }
 0x2ed   :  { %v1362_v44 = vpop.eup %1361 }
 0x356   :  { %v904_v48 = vpop.xlane.xlu1 %903 }
 0x357   :  { %v905_v20 = vadd.f32 %v1360_v30, %v904_v48 }
 0x359   :  { %1363 = vlog2.f32 %v905_v20 }
 0x35b   :  { %v1178_v39 = vpop.xlane.xlu0 %1177 }
 0x35c   :  { %v1179_v31 = vadd.f32 %v1362_v44, %v1178_v39 }
 0x35e   :  { %1365 = vlog2.f32 %v1179_v31 }
 0x35f   :  { %v1364_v40 = vpop.eup %1363 }
 0x360   :  { %v907_v15 = vmul.f32 0.6931472, %v1364_v40 }
 0x362   :  { %v908_v13 = vadd.f32 %v907_v15, %v2390_v25  ;;  %v1203_v25 = vld [vmem:[#allocation7] sm:$0x1] }
 0x364   :  { %v1366_v58 = vpop.eup %1365 }
 0x365   :  { %v1181_v56 = vmul.f32 0.6931472, %v1366_v58 }
 0x367   :  { %v1182_v55 = vadd.f32 %v1181_v56, %v2392_v61 }
 0x369   :  { %v1183_v43 = vadd.f32 %v1182_v55, %v908_v13 }
 0x36b   :  { %v1185_v16 = vsel %vm1184_vm11, %v1183_v43, 0.0 }
 0x36c   :  { %1186 = vadd.xlane.f32.xlu2 %v1185_v16 }
 0x3df   :  { %v1187_v35 = vpop.xlane.xlu2 %1186 }
 0x3e0   :  { %v1188_v6 = vrot.slane %v1187_v35, 4 }
 0x3e2   :  { %v1189_v59 = vadd.f32 %v1188_v6, %v1187_v35 }
 0x3e4   :  { %v1190_v24 = vrot.slane %v1189_v59, 2 }
 0x3e6   :  { %v1191_v63 = vadd.f32 %v1190_v24, %v1189_v59 }
 0x3e8   :  { %v1192_v57 = vrot.slane %v1191_v63, 1 }
 0x3ea   :  { %v1193_v23 = vadd.f32 %v1192_v57, %v1191_v63 }
 0x3ec   :  { %1249 = vpush %v1193_v23 }
 0x41d   :  { %s1250_s0 = spop %1249 }
 0x41e   :  { %v1195_v41 = vstv %s1250_s0 }
 0x41f   :  { %v1196_v61 = vmul.f32 0.125, %v1195_v41 }
 0x421   :  { %v1204_v18 = vadd.f32 %v1203_v25, %v1196_v61 }
 0x423   :  { %1206 = vst.msk [vmem:[#allocation7] sm:$0x1] %vm1201_vm8, %v1204_v18 }
 0x424   :  { %1217 = dma.vmem_to_hbm [thread:$0]  %s1213_s21, 16, %s1215_s24, [#allocation4]  }
 0x425   :  { %1443 = dma.done.wait [#allocation4], 16  }
 0x426   :  { %1444 = vsyncadd [#allocation4], 4294967280 }
 0x427   :  { %1222 = vsyncpa [#allocation3], 1 }
 0x428   :  { %1223 = vsyncpa [#allocation6], 1 }
 0x429   :  { %1224 = vsyncpa [#allocation4], 1 }

</bundles_post_ra>
